<compile_context>
chip_gen: v7x
topology: tpu7x:2x2x1
jax: 0.10.0
libtpu: 0.0.40
codegen_flags: <defaults>
</compile_context>

<pallas_src>
import jax
import jax.numpy as jnp
from jax import lax
from jax.experimental import pallas as pl
from jax.experimental.pallas import tpu as pltpu

B_PAD = 8  # pad the batch to one full sublane group


def gru_disc_kernel(ids_ref, emb_ref, wih_ref, whh_ref, bi_ref, bhn_ref,
                    wl_ref, bl_ref, out_ref, x_buf):
    """Fused embedding gather + GRU recurrence + classifier.

    ids_ref : (B, T)    int32  (SMEM)  token ids
    emb_ref : (V, E)    f32    embedding table
    wih_ref : (3, E, H) f32    per-gate W_i{r,z,n}^T
    whh_ref : (3, H, H) f32    per-gate W_h{r,z,n}^T
    bi_ref  : (3, 1, H) f32    [b_ir+b_hr, b_iz+b_hz, b_in]
    bhn_ref : (1, H)    f32    b_hn (kept separate: it is multiplied by r)
    wl_ref  : (H, 2)    f32    classifier weight^T
    bl_ref  : (1, 2)    f32    classifier bias
    out_ref : (B, 2)    f32
    x_buf   : (T*B_PAD, E) f32 scratch, time-major padded embedded inputs
    """
    B, T = ids_ref.shape
    H = whh_ref.shape[-1]
    b_pad = x_buf.shape[0] // T

    # ---- fused embedding gather (time-major, batch padded to b_pad rows) ----
    x_buf[...] = jnp.zeros_like(x_buf)
    for t in range(T):                       # T, B are tiny & static: unrolled
        for b in range(B):
            tok = ids_ref[b, t]              # scalar read from SMEM
            x_buf[pl.ds(t * b_pad + b, 1), :] = emb_ref[pl.ds(tok, 1), :]
    x = x_buf[...]                           # (T*b_pad, E)

    # ---- per-gate input projections for all timesteps (biases pre-folded) ---
    xw_r = jnp.dot(x, wih_ref[0], preferred_element_type=jnp.float32) + bi_ref[0]
    xw_z = jnp.dot(x, wih_ref[1], preferred_element_type=jnp.float32) + bi_ref[1]
    xw_n = jnp.dot(x, wih_ref[2], preferred_element_type=jnp.float32) + bi_ref[2]

    # Loop-invariant recurrent weights: loaded once, RHS stays staged on MXU.
    w_hr = whh_ref[0]
    w_hz = whh_ref[1]
    w_hn = whh_ref[2]
    # Hoisted broadcast of b_hn (JAX would otherwise re-broadcast every step).
    bhn = jnp.broadcast_to(bhn_ref[...], (b_pad, H))

    # ---- serial recurrence over T steps (unrolled) ---------------------------
    h = jnp.zeros((b_pad, H), jnp.float32)
    for t in range(T):
        lo = t * b_pad                        # static, sublane-aligned offset
        gh_r = jnp.dot(h, w_hr, preferred_element_type=jnp.float32)
        gh_z = jnp.dot(h, w_hz, preferred_element_type=jnp.float32)
        gh_n = jnp.dot(h, w_hn, preferred_element_type=jnp.float32) + bhn
        r = jax.nn.sigmoid(xw_r[lo:lo + b_pad, :] + gh_r)
        z = jax.nn.sigmoid(xw_z[lo:lo + b_pad, :] + gh_z)
        n = jnp.tanh(xw_n[lo:lo + b_pad, :] + r * gh_n)
        h = (1.0 - z) * n + z * h

    # ---- classifier ----------------------------------------------------------
    logits = jnp.dot(h, wl_ref[...], preferred_element_type=jnp.float32) + bl_ref[...]
    out_ref[...] = logits[:B, :].astype(out_ref.dtype)


def init_params(key, input_size, embedd_size, hidden_size):
    k1, k2, k3, k4, k5, k6, k7 = jax.random.split(key, 7)
    kgru = 1.0 / jnp.sqrt(hidden_size)
    klin = 1.0 / jnp.sqrt(hidden_size)
    return {
        # nn.Embedding default init: N(0, 1)
        "embedding": jax.random.normal(k1, (input_size, embedd_size),
                                       jnp.float32),
        # nn.GRU default init: U(-1/sqrt(H), 1/sqrt(H)), gate order [r, z, n]
        "w_ih": jax.random.uniform(k2, (3 * hidden_size, embedd_size),
                                   jnp.float32, -kgru, kgru),
        "w_hh": jax.random.uniform(k3, (3 * hidden_size, hidden_size),
                                   jnp.float32, -kgru, kgru),
        "b_ih": jax.random.uniform(k4, (3 * hidden_size,), jnp.float32,
                                   -kgru, kgru),
        "b_hh": jax.random.uniform(k5, (3 * hidden_size,), jnp.float32,
                                   -kgru, kgru),
        # nn.Linear default init: U(-1/sqrt(fan_in), 1/sqrt(fan_in))
        "w_lin": jax.random.uniform(k6, (2, hidden_size), jnp.float32,
                                    -klin, klin),
        "b_lin": jax.random.uniform(k7, (2,), jnp.float32, -klin, klin),
    }


@jax.jit
def gru_discriminator_forward(token_ids, params):
    B, T = token_ids.shape
    V, E = params["embedding"].shape
    H = params["w_hh"].shape[1]

    # Per-gate weights with a leading gate axis ([r|z|n]), pre-transposed.
    wih_g = params["w_ih"].reshape(3, H, E).transpose(0, 2, 1)   # (3, E, H)
    whh_g = params["w_hh"].reshape(3, H, H).transpose(0, 2, 1)   # (3, H, H)

    b_ih3 = params["b_ih"].reshape(3, H)
    b_hh3 = params["b_hh"].reshape(3, H)
    # Fold b_hr/b_hz into the input-side bias; keep b_hn separate (r * (...)).
    bi = jnp.stack([b_ih3[0] + b_hh3[0],
                    b_ih3[1] + b_hh3[1],
                    b_ih3[2]]).reshape(3, 1, H)
    bhn = b_hh3[2].reshape(1, H)

    wl_t = params["w_lin"].T                                      # (H, 2)
    bl = params["b_lin"].reshape(1, 2)

    return pl.pallas_call(
        gru_disc_kernel,
        out_shape=jax.ShapeDtypeStruct((B, 2), jnp.float32),
        in_specs=[pl.BlockSpec(memory_space=pltpu.MemorySpace.SMEM)]   # ids
                 + [pl.BlockSpec(memory_space=pltpu.MemorySpace.VMEM)] * 7,
        out_specs=pl.BlockSpec(memory_space=pltpu.MemorySpace.VMEM),
        scratch_shapes=[pltpu.VMEM((T * B_PAD, E), jnp.float32)],
        # TODO(synk): if ever called with large B, add a parallel batch grid
        # axis (dimension_semantics=("parallel",)) to use both v7x TensorCores.
    )(token_ids.astype(jnp.int32), params["embedding"].astype(jnp.float32),
      wih_g, whh_g, bi, bhn, wl_t, bl)


def gru_discriminator_reference(token_ids, params):
    """Pure-JAX reference replicating torch semantics."""
    emb = jnp.take(params["embedding"], token_ids, axis=0)
    B, T, E = emb.shape
    H = params["w_hh"].shape[1]
    w_ih, w_hh = params["w_ih"], params["w_hh"]
    b_ih, b_hh = params["b_ih"], params["b_hh"]

    def step(h, x_t):
        gi = x_t @ w_ih.T + b_ih
        gh = h @ w_hh.T + b_hh
        r = jax.nn.sigmoid(gi[:, :H] + gh[:, :H])
        z = jax.nn.sigmoid(gi[:, H:2 * H] + gh[:, H:2 * H])
        n = jnp.tanh(gi[:, 2 * H:] + r * gh[:, 2 * H:])
        h_new = (1.0 - z) * n + z * h
        return h_new, None

    h0 = jnp.zeros((B, H), jnp.float32)
    h_final, _ = lax.scan(step, h0, jnp.transpose(emb, (1, 0, 2)))
    # linear(hidden).squeeze(-1).squeeze(0) -> (B, 2)
    return h_final @ params["w_lin"].T + params["b_lin"]


if __name__ == "__main__":
    argdict = {"input_size": 50, "embedd_size": 32, "hidden_size": 32}
    B, T = 2, 8

    key = jax.random.PRNGKey(0)
    pkey, dkey = jax.random.split(key)
    params = init_params(pkey, argdict["input_size"], argdict["embedd_size"],
                         argdict["hidden_size"])
    token_ids = jax.random.randint(dkey, (B, T), 0, argdict["input_size"],
                                   dtype=jnp.int32)

    out = jax.block_until_ready(gru_discriminator_forward(token_ids, params))
    ref = jax.block_until_ready(gru_discriminator_reference(token_ids, params))

    assert out.shape == (B, 2)
    assert jnp.allclose(out, ref, atol=1e-5, rtol=1e-5)

    print("KERNEL_OK")
</pallas_src>

<mosaic_0001>
module attributes {stable_mosaic.version = 11 : i64} {
  func.func @gru_disc_kernel(%arg0: memref<2x8xi32, #tpu.memory_space<smem>>, %arg1: memref<50x32xf32, #tpu.memory_space<vmem>>, %arg2: memref<3x32x32xf32, #tpu.memory_space<vmem>>, %arg3: memref<3x32x32xf32, #tpu.memory_space<vmem>>, %arg4: memref<3x1x32xf32, #tpu.memory_space<vmem>>, %arg5: memref<1x32xf32, #tpu.memory_space<vmem>>, %arg6: memref<32x2xf32, #tpu.memory_space<vmem>>, %arg7: memref<1x2xf32, #tpu.memory_space<vmem>>, %arg8: memref<2x2xf32, #tpu.memory_space<vmem>>, %arg9: memref<64x32xf32, #tpu.memory_space<vmem>>) attributes {dimension_semantics = [], scalar_prefetch = 0 : i64, scratch_operands = 1 : i64, tpu.core_type = #tpu.core_type<tc>} {
    %cst = arith.constant 0.000000e+00 : f32
    %0 = vector.broadcast %cst : f32 to vector<64x32xf32>
    %c0 = arith.constant 0 : index
    %c0_0 = arith.constant 0 : index
    %1 = vector.load %arg9[%c0, %c0_0] : memref<64x32xf32, #tpu.memory_space<vmem>>, vector<64x32xf32>
    tpu.vector_store %arg9[%c0, %c0_0], %0 {strides = array<i32>} : memref<64x32xf32, #tpu.memory_space<vmem>>, vector<64x32xf32>,
    %c0_1 = arith.constant 0 : index
    %c0_2 = arith.constant 0 : index
    %2 = memref.load %arg0[%c0_1, %c0_2] : memref<2x8xi32, #tpu.memory_space<smem>>
    %3 = arith.index_cast %2 : i32 to index
    %c0_3 = arith.constant 0 : index
    %4 = vector.load %arg1[%3, %c0_3] : memref<50x32xf32, #tpu.memory_space<vmem>>, vector<1x32xf32>
    %c0_4 = arith.constant 0 : index
    %c0_5 = arith.constant 0 : index
    %5 = vector.load %arg9[%c0_4, %c0_5] : memref<64x32xf32, #tpu.memory_space<vmem>>, vector<1x32xf32>
    tpu.vector_store %arg9[%c0_4, %c0_5], %4 {strides = array<i32>} : memref<64x32xf32, #tpu.memory_space<vmem>>, vector<1x32xf32>,
    %c1 = arith.constant 1 : index
    %c0_6 = arith.constant 0 : index
    %6 = memref.load %arg0[%c1, %c0_6] : memref<2x8xi32, #tpu.memory_space<smem>>
    %7 = arith.index_cast %6 : i32 to index
    %c0_7 = arith.constant 0 : index
    %8 = vector.load %arg1[%7, %c0_7] : memref<50x32xf32, #tpu.memory_space<vmem>>, vector<1x32xf32>
    %c1_8 = arith.constant 1 : index
    %c0_9 = arith.constant 0 : index
    %9 = vector.load %arg9[%c1_8, %c0_9] : memref<64x32xf32, #tpu.memory_space<vmem>>, vector<1x32xf32>
    tpu.vector_store %arg9[%c1_8, %c0_9], %8 {strides = array<i32>} : memref<64x32xf32, #tpu.memory_space<vmem>>, vector<1x32xf32>,
    %c0_10 = arith.constant 0 : index
    %c1_11 = arith.constant 1 : index
    %10 = memref.load %arg0[%c0_10, %c1_11] : memref<2x8xi32, #tpu.memory_space<smem>>
    %11 = arith.index_cast %10 : i32 to index
    %c0_12 = arith.constant 0 : index
    %12 = vector.load %arg1[%11, %c0_12] : memref<50x32xf32, #tpu.memory_space<vmem>>, vector<1x32xf32>
    %c8 = arith.constant 8 : index
    %c0_13 = arith.constant 0 : index
    %13 = vector.load %arg9[%c8, %c0_13] : memref<64x32xf32, #tpu.memory_space<vmem>>, vector<1x32xf32>
    tpu.vector_store %arg9[%c8, %c0_13], %12 {strides = array<i32>} : memref<64x32xf32, #tpu.memory_space<vmem>>, vector<1x32xf32>,
    %c1_14 = arith.constant 1 : index
    %c1_15 = arith.constant 1 : index
    %14 = memref.load %arg0[%c1_14, %c1_15] : memref<2x8xi32, #tpu.memory_space<smem>>
    %15 = arith.index_cast %14 : i32 to index
    %c0_16 = arith.constant 0 : index
    %16 = vector.load %arg1[%15, %c0_16] : memref<50x32xf32, #tpu.memory_space<vmem>>, vector<1x32xf32>
    %c9 = arith.constant 9 : index
    %c0_17 = arith.constant 0 : index
    %17 = vector.load %arg9[%c9, %c0_17] : memref<64x32xf32, #tpu.memory_space<vmem>>, vector<1x32xf32>
    tpu.vector_store %arg9[%c9, %c0_17], %16 {strides = array<i32>} : memref<64x32xf32, #tpu.memory_space<vmem>>, vector<1x32xf32>,
    %c0_18 = arith.constant 0 : index
    %c2 = arith.constant 2 : index
    %18 = memref.load %arg0[%c0_18, %c2] : memref<2x8xi32, #tpu.memory_space<smem>>
    %19 = arith.index_cast %18 : i32 to index
    %c0_19 = arith.constant 0 : index
    %20 = vector.load %arg1[%19, %c0_19] : memref<50x32xf32, #tpu.memory_space<vmem>>, vector<1x32xf32>
    %c16 = arith.constant 16 : index
    %c0_20 = arith.constant 0 : index
    %21 = vector.load %arg9[%c16, %c0_20] : memref<64x32xf32, #tpu.memory_space<vmem>>, vector<1x32xf32>
    tpu.vector_store %arg9[%c16, %c0_20], %20 {strides = array<i32>} : memref<64x32xf32, #tpu.memory_space<vmem>>, vector<1x32xf32>,
    %c1_21 = arith.constant 1 : index
    %c2_22 = arith.constant 2 : index
    %22 = memref.load %arg0[%c1_21, %c2_22] : memref<2x8xi32, #tpu.memory_space<smem>>
    %23 = arith.index_cast %22 : i32 to index
    %c0_23 = arith.constant 0 : index
    %24 = vector.load %arg1[%23, %c0_23] : memref<50x32xf32, #tpu.memory_space<vmem>>, vector<1x32xf32>
    %c17 = arith.constant 17 : index
    %c0_24 = arith.constant 0 : index
    %25 = vector.load %arg9[%c17, %c0_24] : memref<64x32xf32, #tpu.memory_space<vmem>>, vector<1x32xf32>
    tpu.vector_store %arg9[%c17, %c0_24], %24 {strides = array<i32>} : memref<64x32xf32, #tpu.memory_space<vmem>>, vector<1x32xf32>,
    %c0_25 = arith.constant 0 : index
    %c3 = arith.constant 3 : index
    %26 = memref.load %arg0[%c0_25, %c3] : memref<2x8xi32, #tpu.memory_space<smem>>
    %27 = arith.index_cast %26 : i32 to index
    %c0_26 = arith.constant 0 : index
    %28 = vector.load %arg1[%27, %c0_26] : memref<50x32xf32, #tpu.memory_space<vmem>>, vector<1x32xf32>
    %c24 = arith.constant 24 : index
    %c0_27 = arith.constant 0 : index
    %29 = vector.load %arg9[%c24, %c0_27] : memref<64x32xf32, #tpu.memory_space<vmem>>, vector<1x32xf32>
    tpu.vector_store %arg9[%c24, %c0_27], %28 {strides = array<i32>} : memref<64x32xf32, #tpu.memory_space<vmem>>, vector<1x32xf32>,
    %c1_28 = arith.constant 1 : index
    %c3_29 = arith.constant 3 : index
    %30 = memref.load %arg0[%c1_28, %c3_29] : memref<2x8xi32, #tpu.memory_space<smem>>
    %31 = arith.index_cast %30 : i32 to index
    %c0_30 = arith.constant 0 : index
    %32 = vector.load %arg1[%31, %c0_30] : memref<50x32xf32, #tpu.memory_space<vmem>>, vector<1x32xf32>
    %c25 = arith.constant 25 : index
    %c0_31 = arith.constant 0 : index
    %33 = vector.load %arg9[%c25, %c0_31] : memref<64x32xf32, #tpu.memory_space<vmem>>, vector<1x32xf32>
    tpu.vector_store %arg9[%c25, %c0_31], %32 {strides = array<i32>} : memref<64x32xf32, #tpu.memory_space<vmem>>, vector<1x32xf32>,
    %c0_32 = arith.constant 0 : index
    %c4 = arith.constant 4 : index
    %34 = memref.load %arg0[%c0_32, %c4] : memref<2x8xi32, #tpu.memory_space<smem>>
    %35 = arith.index_cast %34 : i32 to index
    %c0_33 = arith.constant 0 : index
    %36 = vector.load %arg1[%35, %c0_33] : memref<50x32xf32, #tpu.memory_space<vmem>>, vector<1x32xf32>
    %c32 = arith.constant 32 : index
    %c0_34 = arith.constant 0 : index
    %37 = vector.load %arg9[%c32, %c0_34] : memref<64x32xf32, #tpu.memory_space<vmem>>, vector<1x32xf32>
    tpu.vector_store %arg9[%c32, %c0_34], %36 {strides = array<i32>} : memref<64x32xf32, #tpu.memory_space<vmem>>, vector<1x32xf32>,
    %c1_35 = arith.constant 1 : index
    %c4_36 = arith.constant 4 : index
    %38 = memref.load %arg0[%c1_35, %c4_36] : memref<2x8xi32, #tpu.memory_space<smem>>
    %39 = arith.index_cast %38 : i32 to index
    %c0_37 = arith.constant 0 : index
    %40 = vector.load %arg1[%39, %c0_37] : memref<50x32xf32, #tpu.memory_space<vmem>>, vector<1x32xf32>
    %c33 = arith.constant 33 : index
    %c0_38 = arith.constant 0 : index
    %41 = vector.load %arg9[%c33, %c0_38] : memref<64x32xf32, #tpu.memory_space<vmem>>, vector<1x32xf32>
    tpu.vector_store %arg9[%c33, %c0_38], %40 {strides = array<i32>} : memref<64x32xf32, #tpu.memory_space<vmem>>, vector<1x32xf32>,
    %c0_39 = arith.constant 0 : index
    %c5 = arith.constant 5 : index
    %42 = memref.load %arg0[%c0_39, %c5] : memref<2x8xi32, #tpu.memory_space<smem>>
    %43 = arith.index_cast %42 : i32 to index
    %c0_40 = arith.constant 0 : index
    %44 = vector.load %arg1[%43, %c0_40] : memref<50x32xf32, #tpu.memory_space<vmem>>, vector<1x32xf32>
    %c40 = arith.constant 40 : index
    %c0_41 = arith.constant 0 : index
    %45 = vector.load %arg9[%c40, %c0_41] : memref<64x32xf32, #tpu.memory_space<vmem>>, vector<1x32xf32>
    tpu.vector_store %arg9[%c40, %c0_41], %44 {strides = array<i32>} : memref<64x32xf32, #tpu.memory_space<vmem>>, vector<1x32xf32>,
    %c1_42 = arith.constant 1 : index
    %c5_43 = arith.constant 5 : index
    %46 = memref.load %arg0[%c1_42, %c5_43] : memref<2x8xi32, #tpu.memory_space<smem>>
    %47 = arith.index_cast %46 : i32 to index
    %c0_44 = arith.constant 0 : index
    %48 = vector.load %arg1[%47, %c0_44] : memref<50x32xf32, #tpu.memory_space<vmem>>, vector<1x32xf32>
    %c41 = arith.constant 41 : index
    %c0_45 = arith.constant 0 : index
    %49 = vector.load %arg9[%c41, %c0_45] : memref<64x32xf32, #tpu.memory_space<vmem>>, vector<1x32xf32>
    tpu.vector_store %arg9[%c41, %c0_45], %48 {strides = array<i32>} : memref<64x32xf32, #tpu.memory_space<vmem>>, vector<1x32xf32>,
    %c0_46 = arith.constant 0 : index
    %c6 = arith.constant 6 : index
    %50 = memref.load %arg0[%c0_46, %c6] : memref<2x8xi32, #tpu.memory_space<smem>>
    %51 = arith.index_cast %50 : i32 to index
    %c0_47 = arith.constant 0 : index
    %52 = vector.load %arg1[%51, %c0_47] : memref<50x32xf32, #tpu.memory_space<vmem>>, vector<1x32xf32>
    %c48 = arith.constant 48 : index
    %c0_48 = arith.constant 0 : index
    %53 = vector.load %arg9[%c48, %c0_48] : memref<64x32xf32, #tpu.memory_space<vmem>>, vector<1x32xf32>
    tpu.vector_store %arg9[%c48, %c0_48], %52 {strides = array<i32>} : memref<64x32xf32, #tpu.memory_space<vmem>>, vector<1x32xf32>,
    %c1_49 = arith.constant 1 : index
    %c6_50 = arith.constant 6 : index
    %54 = memref.load %arg0[%c1_49, %c6_50] : memref<2x8xi32, #tpu.memory_space<smem>>
    %55 = arith.index_cast %54 : i32 to index
    %c0_51 = arith.constant 0 : index
    %56 = vector.load %arg1[%55, %c0_51] : memref<50x32xf32, #tpu.memory_space<vmem>>, vector<1x32xf32>
    %c49 = arith.constant 49 : index
    %c0_52 = arith.constant 0 : index
    %57 = vector.load %arg9[%c49, %c0_52] : memref<64x32xf32, #tpu.memory_space<vmem>>, vector<1x32xf32>
    tpu.vector_store %arg9[%c49, %c0_52], %56 {strides = array<i32>} : memref<64x32xf32, #tpu.memory_space<vmem>>, vector<1x32xf32>,
    %c0_53 = arith.constant 0 : index
    %c7 = arith.constant 7 : index
    %58 = memref.load %arg0[%c0_53, %c7] : memref<2x8xi32, #tpu.memory_space<smem>>
    %59 = arith.index_cast %58 : i32 to index
    %c0_54 = arith.constant 0 : index
    %60 = vector.load %arg1[%59, %c0_54] : memref<50x32xf32, #tpu.memory_space<vmem>>, vector<1x32xf32>
    %c56 = arith.constant 56 : index
    %c0_55 = arith.constant 0 : index
    %61 = vector.load %arg9[%c56, %c0_55] : memref<64x32xf32, #tpu.memory_space<vmem>>, vector<1x32xf32>
    tpu.vector_store %arg9[%c56, %c0_55], %60 {strides = array<i32>} : memref<64x32xf32, #tpu.memory_space<vmem>>, vector<1x32xf32>,
    %c1_56 = arith.constant 1 : index
    %c7_57 = arith.constant 7 : index
    %62 = memref.load %arg0[%c1_56, %c7_57] : memref<2x8xi32, #tpu.memory_space<smem>>
    %63 = arith.index_cast %62 : i32 to index
    %c0_58 = arith.constant 0 : index
    %64 = vector.load %arg1[%63, %c0_58] : memref<50x32xf32, #tpu.memory_space<vmem>>, vector<1x32xf32>
    %c57 = arith.constant 57 : index
    %c0_59 = arith.constant 0 : index
    %65 = vector.load %arg9[%c57, %c0_59] : memref<64x32xf32, #tpu.memory_space<vmem>>, vector<1x32xf32>
    tpu.vector_store %arg9[%c57, %c0_59], %64 {strides = array<i32>} : memref<64x32xf32, #tpu.memory_space<vmem>>, vector<1x32xf32>,
    %c0_60 = arith.constant 0 : index
    %c0_61 = arith.constant 0 : index
    %66 = vector.load %arg9[%c0_60, %c0_61] : memref<64x32xf32, #tpu.memory_space<vmem>>, vector<64x32xf32>
    %c0_62 = arith.constant 0 : index
    %c0_63 = arith.constant 0 : index
    %c0_64 = arith.constant 0 : index
    %67 = vector.load %arg2[%c0_62, %c0_63, %c0_64] : memref<3x32x32xf32, #tpu.memory_space<vmem>>, vector<1x32x32xf32>
    %68 = vector.shape_cast %67 : vector<1x32x32xf32> to vector<32x32xf32>
    %cst_65 = arith.constant dense<0.000000e+00> : vector<64x32xf32>
    %69 = tpu.matmul %66, %68, %cst_65 {dimension_numbers = #tpu.dot_dimension_numbers<[1], [0], [0], [1], [0, 0, 1, 1], [], []>} : vector<64x32xf32>, vector<32x32xf32>, vector<64x32xf32> -> vector<64x32xf32>
    %c0_66 = arith.constant 0 : index
    %c0_67 = arith.constant 0 : index
    %c0_68 = arith.constant 0 : index
    %70 = vector.load %arg4[%c0_66, %c0_67, %c0_68] : memref<3x1x32xf32, #tpu.memory_space<vmem>>, vector<1x1x32xf32>
    %71 = vector.shape_cast %70 : vector<1x1x32xf32> to vector<1x32xf32>
    %72 = vector.broadcast %71 : vector<1x32xf32> to vector<64x32xf32>
    %73 = arith.addf %69, %72 : vector<64x32xf32>
    %c1_69 = arith.constant 1 : index
    %c0_70 = arith.constant 0 : index
    %c0_71 = arith.constant 0 : index
    %74 = vector.load %arg2[%c1_69, %c0_70, %c0_71] : memref<3x32x32xf32, #tpu.memory_space<vmem>>, vector<1x32x32xf32>
    %75 = vector.shape_cast %74 : vector<1x32x32xf32> to vector<32x32xf32>
    %cst_72 = arith.constant dense<0.000000e+00> : vector<64x32xf32>
    %76 = tpu.matmul %66, %75, %cst_72 {dimension_numbers = #tpu.dot_dimension_numbers<[1], [0], [0], [1], [0, 0, 1, 1], [], []>} : vector<64x32xf32>, vector<32x32xf32>, vector<64x32xf32> -> vector<64x32xf32>
    %c1_73 = arith.constant 1 : index
    %c0_74 = arith.constant 0 : index
    %c0_75 = arith.constant 0 : index
    %77 = vector.load %arg4[%c1_73, %c0_74, %c0_75] : memref<3x1x32xf32, #tpu.memory_space<vmem>>, vector<1x1x32xf32>
    %78 = vector.shape_cast %77 : vector<1x1x32xf32> to vector<1x32xf32>
    %79 = vector.broadcast %78 : vector<1x32xf32> to vector<64x32xf32>
    %80 = arith.addf %76, %79 : vector<64x32xf32>
    %c2_76 = arith.constant 2 : index
    %c0_77 = arith.constant 0 : index
    %c0_78 = arith.constant 0 : index
    %81 = vector.load %arg2[%c2_76, %c0_77, %c0_78] : memref<3x32x32xf32, #tpu.memory_space<vmem>>, vector<1x32x32xf32>
    %82 = vector.shape_cast %81 : vector<1x32x32xf32> to vector<32x32xf32>
    %cst_79 = arith.constant dense<0.000000e+00> : vector<64x32xf32>
    %83 = tpu.matmul %66, %82, %cst_79 {dimension_numbers = #tpu.dot_dimension_numbers<[1], [0], [0], [1], [0, 0, 1, 1], [], []>} : vector<64x32xf32>, vector<32x32xf32>, vector<64x32xf32> -> vector<64x32xf32>
    %c2_80 = arith.constant 2 : index
    %c0_81 = arith.constant 0 : index
    %c0_82 = arith.constant 0 : index
    %84 = vector.load %arg4[%c2_80, %c0_81, %c0_82] : memref<3x1x32xf32, #tpu.memory_space<vmem>>, vector<1x1x32xf32>
    %85 = vector.shape_cast %84 : vector<1x1x32xf32> to vector<1x32xf32>
    %86 = vector.broadcast %85 : vector<1x32xf32> to vector<64x32xf32>
    %87 = arith.addf %83, %86 : vector<64x32xf32>
    %c0_83 = arith.constant 0 : index
    %c0_84 = arith.constant 0 : index
    %c0_85 = arith.constant 0 : index
    %88 = vector.load %arg3[%c0_83, %c0_84, %c0_85] : memref<3x32x32xf32, #tpu.memory_space<vmem>>, vector<1x32x32xf32>
    %89 = vector.shape_cast %88 : vector<1x32x32xf32> to vector<32x32xf32>
    %c1_86 = arith.constant 1 : index
    %c0_87 = arith.constant 0 : index
    %c0_88 = arith.constant 0 : index
    %90 = vector.load %arg3[%c1_86, %c0_87, %c0_88] : memref<3x32x32xf32, #tpu.memory_space<vmem>>, vector<1x32x32xf32>
    %91 = vector.shape_cast %90 : vector<1x32x32xf32> to vector<32x32xf32>
    %c2_89 = arith.constant 2 : index
    %c0_90 = arith.constant 0 : index
    %c0_91 = arith.constant 0 : index
    %92 = vector.load %arg3[%c2_89, %c0_90, %c0_91] : memref<3x32x32xf32, #tpu.memory_space<vmem>>, vector<1x32x32xf32>
    %93 = vector.shape_cast %92 : vector<1x32x32xf32> to vector<32x32xf32>
    %c0_92 = arith.constant 0 : index
    %c0_93 = arith.constant 0 : index
    %94 = vector.load %arg5[%c0_92, %c0_93] : memref<1x32xf32, #tpu.memory_space<vmem>>, vector<1x32xf32>
    %95 = vector.shape_cast %94 : vector<1x32xf32> to vector<1x32xf32>
    %96 = vector.broadcast %95 : vector<1x32xf32> to vector<8x32xf32>
    %cst_94 = arith.constant 0.000000e+00 : f32
    %97 = vector.broadcast %cst_94 : f32 to vector<8x32xf32>
    %cst_95 = arith.constant dense<0.000000e+00> : vector<8x32xf32>
    %98 = tpu.matmul %97, %89, %cst_95 {dimension_numbers = #tpu.dot_dimension_numbers<[1], [0], [0], [1], [0, 0, 1, 1], [], []>} : vector<8x32xf32>, vector<32x32xf32>, vector<8x32xf32> -> vector<8x32xf32>
    %cst_96 = arith.constant dense<0.000000e+00> : vector<8x32xf32>
    %99 = tpu.matmul %97, %91, %cst_96 {dimension_numbers = #tpu.dot_dimension_numbers<[1], [0], [0], [1], [0, 0, 1, 1], [], []>} : vector<8x32xf32>, vector<32x32xf32>, vector<8x32xf32> -> vector<8x32xf32>
    %cst_97 = arith.constant dense<0.000000e+00> : vector<8x32xf32>
    %100 = tpu.matmul %97, %93, %cst_97 {dimension_numbers = #tpu.dot_dimension_numbers<[1], [0], [0], [1], [0, 0, 1, 1], [], []>} : vector<8x32xf32>, vector<32x32xf32>, vector<8x32xf32> -> vector<8x32xf32>
    %101 = arith.addf %100, %96 : vector<8x32xf32>
    %102 = vector.extract_strided_slice %73 {offsets = [0, 0], sizes = [8, 32], strides = [1, 1]} : vector<64x32xf32> to vector<8x32xf32>
    %103 = arith.addf %102, %98 : vector<8x32xf32>
    %104 = arith.negf %103 : vector<8x32xf32>
    %105 = math.exp %104 : vector<8x32xf32>
    %cst_98 = arith.constant 1.000000e+00 : f32
    %106 = vector.broadcast %cst_98 : f32 to vector<8x32xf32>
    %107 = arith.addf %106, %105 : vector<8x32xf32>
    %108 = arith.divf %106, %107 : vector<8x32xf32>
    %109 = vector.extract_strided_slice %80 {offsets = [0, 0], sizes = [8, 32], strides = [1, 1]} : vector<64x32xf32> to vector<8x32xf32>
    %110 = arith.addf %109, %99 : vector<8x32xf32>
    %111 = arith.negf %110 : vector<8x32xf32>
    %112 = math.exp %111 : vector<8x32xf32>
    %cst_99 = arith.constant 1.000000e+00 : f32
    %113 = vector.broadcast %cst_99 : f32 to vector<8x32xf32>
    %114 = arith.addf %113, %112 : vector<8x32xf32>
    %115 = arith.divf %113, %114 : vector<8x32xf32>
    %116 = vector.extract_strided_slice %87 {offsets = [0, 0], sizes = [8, 32], strides = [1, 1]} : vector<64x32xf32> to vector<8x32xf32>
    %117 = arith.mulf %108, %101 : vector<8x32xf32>
    %118 = arith.addf %116, %117 : vector<8x32xf32>
    %119 = math.tanh %118 : vector<8x32xf32>
    %cst_100 = arith.constant 1.000000e+00 : f32
    %120 = vector.broadcast %cst_100 : f32 to vector<8x32xf32>
    %121 = arith.subf %120, %115 : vector<8x32xf32>
    %122 = arith.mulf %121, %119 : vector<8x32xf32>
    %123 = arith.mulf %115, %97 : vector<8x32xf32>
    %124 = arith.addf %122, %123 : vector<8x32xf32>
    %cst_101 = arith.constant dense<0.000000e+00> : vector<8x32xf32>
    %125 = tpu.matmul %124, %89, %cst_101 {dimension_numbers = #tpu.dot_dimension_numbers<[1], [0], [0], [1], [0, 0, 1, 1], [], []>} : vector<8x32xf32>, vector<32x32xf32>, vector<8x32xf32> -> vector<8x32xf32>
    %cst_102 = arith.constant dense<0.000000e+00> : vector<8x32xf32>
    %126 = tpu.matmul %124, %91, %cst_102 {dimension_numbers = #tpu.dot_dimension_numbers<[1], [0], [0], [1], [0, 0, 1, 1], [], []>} : vector<8x32xf32>, vector<32x32xf32>, vector<8x32xf32> -> vector<8x32xf32>
    %cst_103 = arith.constant dense<0.000000e+00> : vector<8x32xf32>
    %127 = tpu.matmul %124, %93, %cst_103 {dimension_numbers = #tpu.dot_dimension_numbers<[1], [0], [0], [1], [0, 0, 1, 1], [], []>} : vector<8x32xf32>, vector<32x32xf32>, vector<8x32xf32> -> vector<8x32xf32>
    %128 = arith.addf %127, %96 : vector<8x32xf32>
    %129 = vector.extract_strided_slice %73 {offsets = [8, 0], sizes = [8, 32], strides = [1, 1]} : vector<64x32xf32> to vector<8x32xf32>
    %130 = arith.addf %129, %125 : vector<8x32xf32>
    %131 = arith.negf %130 : vector<8x32xf32>
    %132 = math.exp %131 : vector<8x32xf32>
    %cst_104 = arith.constant 1.000000e+00 : f32
    %133 = vector.broadcast %cst_104 : f32 to vector<8x32xf32>
    %134 = arith.addf %133, %132 : vector<8x32xf32>
    %135 = arith.divf %133, %134 : vector<8x32xf32>
    %136 = vector.extract_strided_slice %80 {offsets = [8, 0], sizes = [8, 32], strides = [1, 1]} : vector<64x32xf32> to vector<8x32xf32>
    %137 = arith.addf %136, %126 : vector<8x32xf32>
    %138 = arith.negf %137 : vector<8x32xf32>
    %139 = math.exp %138 : vector<8x32xf32>
    %cst_105 = arith.constant 1.000000e+00 : f32
    %140 = vector.broadcast %cst_105 : f32 to vector<8x32xf32>
    %141 = arith.addf %140, %139 : vector<8x32xf32>
    %142 = arith.divf %140, %141 : vector<8x32xf32>
    %143 = vector.extract_strided_slice %87 {offsets = [8, 0], sizes = [8, 32], strides = [1, 1]} : vector<64x32xf32> to vector<8x32xf32>
    %144 = arith.mulf %135, %128 : vector<8x32xf32>
    %145 = arith.addf %143, %144 : vector<8x32xf32>
    %146 = math.tanh %145 : vector<8x32xf32>
    %cst_106 = arith.constant 1.000000e+00 : f32
    %147 = vector.broadcast %cst_106 : f32 to vector<8x32xf32>
    %148 = arith.subf %147, %142 : vector<8x32xf32>
    %149 = arith.mulf %148, %146 : vector<8x32xf32>
    %150 = arith.mulf %142, %124 : vector<8x32xf32>
    %151 = arith.addf %149, %150 : vector<8x32xf32>
    %cst_107 = arith.constant dense<0.000000e+00> : vector<8x32xf32>
    %152 = tpu.matmul %151, %89, %cst_107 {dimension_numbers = #tpu.dot_dimension_numbers<[1], [0], [0], [1], [0, 0, 1, 1], [], []>} : vector<8x32xf32>, vector<32x32xf32>, vector<8x32xf32> -> vector<8x32xf32>
    %cst_108 = arith.constant dense<0.000000e+00> : vector<8x32xf32>
    %153 = tpu.matmul %151, %91, %cst_108 {dimension_numbers = #tpu.dot_dimension_numbers<[1], [0], [0], [1], [0, 0, 1, 1], [], []>} : vector<8x32xf32>, vector<32x32xf32>, vector<8x32xf32> -> vector<8x32xf32>
    %cst_109 = arith.constant dense<0.000000e+00> : vector<8x32xf32>
    %154 = tpu.matmul %151, %93, %cst_109 {dimension_numbers = #tpu.dot_dimension_numbers<[1], [0], [0], [1], [0, 0, 1, 1], [], []>} : vector<8x32xf32>, vector<32x32xf32>, vector<8x32xf32> -> vector<8x32xf32>
    %155 = arith.addf %154, %96 : vector<8x32xf32>
    %156 = vector.extract_strided_slice %73 {offsets = [16, 0], sizes = [8, 32], strides = [1, 1]} : vector<64x32xf32> to vector<8x32xf32>
    %157 = arith.addf %156, %152 : vector<8x32xf32>
    %158 = arith.negf %157 : vector<8x32xf32>
    %159 = math.exp %158 : vector<8x32xf32>
    %cst_110 = arith.constant 1.000000e+00 : f32
    %160 = vector.broadcast %cst_110 : f32 to vector<8x32xf32>
    %161 = arith.addf %160, %159 : vector<8x32xf32>
    %162 = arith.divf %160, %161 : vector<8x32xf32>
    %163 = vector.extract_strided_slice %80 {offsets = [16, 0], sizes = [8, 32], strides = [1, 1]} : vector<64x32xf32> to vector<8x32xf32>
    %164 = arith.addf %163, %153 : vector<8x32xf32>
    %165 = arith.negf %164 : vector<8x32xf32>
    %166 = math.exp %165 : vector<8x32xf32>
    %cst_111 = arith.constant 1.000000e+00 : f32
    %167 = vector.broadcast %cst_111 : f32 to vector<8x32xf32>
    %168 = arith.addf %167, %166 : vector<8x32xf32>
    %169 = arith.divf %167, %168 : vector<8x32xf32>
    %170 = vector.extract_strided_slice %87 {offsets = [16, 0], sizes = [8, 32], strides = [1, 1]} : vector<64x32xf32> to vector<8x32xf32>
    %171 = arith.mulf %162, %155 : vector<8x32xf32>
    %172 = arith.addf %170, %171 : vector<8x32xf32>
    %173 = math.tanh %172 : vector<8x32xf32>
    %cst_112 = arith.constant 1.000000e+00 : f32
    %174 = vector.broadcast %cst_112 : f32 to vector<8x32xf32>
    %175 = arith.subf %174, %169 : vector<8x32xf32>
    %176 = arith.mulf %175, %173 : vector<8x32xf32>
    %177 = arith.mulf %169, %151 : vector<8x32xf32>
    %178 = arith.addf %176, %177 : vector<8x32xf32>
    %cst_113 = arith.constant dense<0.000000e+00> : vector<8x32xf32>
    %179 = tpu.matmul %178, %89, %cst_113 {dimension_numbers = #tpu.dot_dimension_numbers<[1], [0], [0], [1], [0, 0, 1, 1], [], []>} : vector<8x32xf32>, vector<32x32xf32>, vector<8x32xf32> -> vector<8x32xf32>
    %cst_114 = arith.constant dense<0.000000e+00> : vector<8x32xf32>
    %180 = tpu.matmul %178, %91, %cst_114 {dimension_numbers = #tpu.dot_dimension_numbers<[1], [0], [0], [1], [0, 0, 1, 1], [], []>} : vector<8x32xf32>, vector<32x32xf32>, vector<8x32xf32> -> vector<8x32xf32>
    %cst_115 = arith.constant dense<0.000000e+00> : vector<8x32xf32>
    %181 = tpu.matmul %178, %93, %cst_115 {dimension_numbers = #tpu.dot_dimension_numbers<[1], [0], [0], [1], [0, 0, 1, 1], [], []>} : vector<8x32xf32>, vector<32x32xf32>, vector<8x32xf32> -> vector<8x32xf32>
    %182 = arith.addf %181, %96 : vector<8x32xf32>
    %183 = vector.extract_strided_slice %73 {offsets = [24, 0], sizes = [8, 32], strides = [1, 1]} : vector<64x32xf32> to vector<8x32xf32>
    %184 = arith.addf %183, %179 : vector<8x32xf32>
    %185 = arith.negf %184 : vector<8x32xf32>
    %186 = math.exp %185 : vector<8x32xf32>
    %cst_116 = arith.constant 1.000000e+00 : f32
    %187 = vector.broadcast %cst_116 : f32 to vector<8x32xf32>
    %188 = arith.addf %187, %186 : vector<8x32xf32>
    %189 = arith.divf %187, %188 : vector<8x32xf32>
    %190 = vector.extract_strided_slice %80 {offsets = [24, 0], sizes = [8, 32], strides = [1, 1]} : vector<64x32xf32> to vector<8x32xf32>
    %191 = arith.addf %190, %180 : vector<8x32xf32>
    %192 = arith.negf %191 : vector<8x32xf32>
    %193 = math.exp %192 : vector<8x32xf32>
    %cst_117 = arith.constant 1.000000e+00 : f32
    %194 = vector.broadcast %cst_117 : f32 to vector<8x32xf32>
    %195 = arith.addf %194, %193 : vector<8x32xf32>
    %196 = arith.divf %194, %195 : vector<8x32xf32>
    %197 = vector.extract_strided_slice %87 {offsets = [24, 0], sizes = [8, 32], strides = [1, 1]} : vector<64x32xf32> to vector<8x32xf32>
    %198 = arith.mulf %189, %182 : vector<8x32xf32>
    %199 = arith.addf %197, %198 : vector<8x32xf32>
    %200 = math.tanh %199 : vector<8x32xf32>
    %cst_118 = arith.constant 1.000000e+00 : f32
    %201 = vector.broadcast %cst_118 : f32 to vector<8x32xf32>
    %202 = arith.subf %201, %196 : vector<8x32xf32>
    %203 = arith.mulf %202, %200 : vector<8x32xf32>
    %204 = arith.mulf %196, %178 : vector<8x32xf32>
    %205 = arith.addf %203, %204 : vector<8x32xf32>
    %cst_119 = arith.constant dense<0.000000e+00> : vector<8x32xf32>
    %206 = tpu.matmul %205, %89, %cst_119 {dimension_numbers = #tpu.dot_dimension_numbers<[1], [0], [0], [1], [0, 0, 1, 1], [], []>} : vector<8x32xf32>, vector<32x32xf32>, vector<8x32xf32> -> vector<8x32xf32>
    %cst_120 = arith.constant dense<0.000000e+00> : vector<8x32xf32>
    %207 = tpu.matmul %205, %91, %cst_120 {dimension_numbers = #tpu.dot_dimension_numbers<[1], [0], [0], [1], [0, 0, 1, 1], [], []>} : vector<8x32xf32>, vector<32x32xf32>, vector<8x32xf32> -> vector<8x32xf32>
    %cst_121 = arith.constant dense<0.000000e+00> : vector<8x32xf32>
    %208 = tpu.matmul %205, %93, %cst_121 {dimension_numbers = #tpu.dot_dimension_numbers<[1], [0], [0], [1], [0, 0, 1, 1], [], []>} : vector<8x32xf32>, vector<32x32xf32>, vector<8x32xf32> -> vector<8x32xf32>
    %209 = arith.addf %208, %96 : vector<8x32xf32>
    %210 = vector.extract_strided_slice %73 {offsets = [32, 0], sizes = [8, 32], strides = [1, 1]} : vector<64x32xf32> to vector<8x32xf32>
    %211 = arith.addf %210, %206 : vector<8x32xf32>
    %212 = arith.negf %211 : vector<8x32xf32>
    %213 = math.exp %212 : vector<8x32xf32>
    %cst_122 = arith.constant 1.000000e+00 : f32
    %214 = vector.broadcast %cst_122 : f32 to vector<8x32xf32>
    %215 = arith.addf %214, %213 : vector<8x32xf32>
    %216 = arith.divf %214, %215 : vector<8x32xf32>
    %217 = vector.extract_strided_slice %80 {offsets = [32, 0], sizes = [8, 32], strides = [1, 1]} : vector<64x32xf32> to vector<8x32xf32>
    %218 = arith.addf %217, %207 : vector<8x32xf32>
    %219 = arith.negf %218 : vector<8x32xf32>
    %220 = math.exp %219 : vector<8x32xf32>
    %cst_123 = arith.constant 1.000000e+00 : f32
    %221 = vector.broadcast %cst_123 : f32 to vector<8x32xf32>
    %222 = arith.addf %221, %220 : vector<8x32xf32>
    %223 = arith.divf %221, %222 : vector<8x32xf32>
    %224 = vector.extract_strided_slice %87 {offsets = [32, 0], sizes = [8, 32], strides = [1, 1]} : vector<64x32xf32> to vector<8x32xf32>
    %225 = arith.mulf %216, %209 : vector<8x32xf32>
    %226 = arith.addf %224, %225 : vector<8x32xf32>
    %227 = math.tanh %226 : vector<8x32xf32>
    %cst_124 = arith.constant 1.000000e+00 : f32
    %228 = vector.broadcast %cst_124 : f32 to vector<8x32xf32>
    %229 = arith.subf %228, %223 : vector<8x32xf32>
    %230 = arith.mulf %229, %227 : vector<8x32xf32>
    %231 = arith.mulf %223, %205 : vector<8x32xf32>
    %232 = arith.addf %230, %231 : vector<8x32xf32>
    %cst_125 = arith.constant dense<0.000000e+00> : vector<8x32xf32>
    %233 = tpu.matmul %232, %89, %cst_125 {dimension_numbers = #tpu.dot_dimension_numbers<[1], [0], [0], [1], [0, 0, 1, 1], [], []>} : vector<8x32xf32>, vector<32x32xf32>, vector<8x32xf32> -> vector<8x32xf32>
    %cst_126 = arith.constant dense<0.000000e+00> : vector<8x32xf32>
    %234 = tpu.matmul %232, %91, %cst_126 {dimension_numbers = #tpu.dot_dimension_numbers<[1], [0], [0], [1], [0, 0, 1, 1], [], []>} : vector<8x32xf32>, vector<32x32xf32>, vector<8x32xf32> -> vector<8x32xf32>
    %cst_127 = arith.constant dense<0.000000e+00> : vector<8x32xf32>
    %235 = tpu.matmul %232, %93, %cst_127 {dimension_numbers = #tpu.dot_dimension_numbers<[1], [0], [0], [1], [0, 0, 1, 1], [], []>} : vector<8x32xf32>, vector<32x32xf32>, vector<8x32xf32> -> vector<8x32xf32>
    %236 = arith.addf %235, %96 : vector<8x32xf32>
    %237 = vector.extract_strided_slice %73 {offsets = [40, 0], sizes = [8, 32], strides = [1, 1]} : vector<64x32xf32> to vector<8x32xf32>
    %238 = arith.addf %237, %233 : vector<8x32xf32>
    %239 = arith.negf %238 : vector<8x32xf32>
    %240 = math.exp %239 : vector<8x32xf32>
    %cst_128 = arith.constant 1.000000e+00 : f32
    %241 = vector.broadcast %cst_128 : f32 to vector<8x32xf32>
    %242 = arith.addf %241, %240 : vector<8x32xf32>
    %243 = arith.divf %241, %242 : vector<8x32xf32>
    %244 = vector.extract_strided_slice %80 {offsets = [40, 0], sizes = [8, 32], strides = [1, 1]} : vector<64x32xf32> to vector<8x32xf32>
    %245 = arith.addf %244, %234 : vector<8x32xf32>
    %246 = arith.negf %245 : vector<8x32xf32>
    %247 = math.exp %246 : vector<8x32xf32>
    %cst_129 = arith.constant 1.000000e+00 : f32
    %248 = vector.broadcast %cst_129 : f32 to vector<8x32xf32>
    %249 = arith.addf %248, %247 : vector<8x32xf32>
    %250 = arith.divf %248, %249 : vector<8x32xf32>
    %251 = vector.extract_strided_slice %87 {offsets = [40, 0], sizes = [8, 32], strides = [1, 1]} : vector<64x32xf32> to vector<8x32xf32>
    %252 = arith.mulf %243, %236 : vector<8x32xf32>
    %253 = arith.addf %251, %252 : vector<8x32xf32>
    %254 = math.tanh %253 : vector<8x32xf32>
    %cst_130 = arith.constant 1.000000e+00 : f32
    %255 = vector.broadcast %cst_130 : f32 to vector<8x32xf32>
    %256 = arith.subf %255, %250 : vector<8x32xf32>
    %257 = arith.mulf %256, %254 : vector<8x32xf32>
    %258 = arith.mulf %250, %232 : vector<8x32xf32>
    %259 = arith.addf %257, %258 : vector<8x32xf32>
    %cst_131 = arith.constant dense<0.000000e+00> : vector<8x32xf32>
    %260 = tpu.matmul %259, %89, %cst_131 {dimension_numbers = #tpu.dot_dimension_numbers<[1], [0], [0], [1], [0, 0, 1, 1], [], []>} : vector<8x32xf32>, vector<32x32xf32>, vector<8x32xf32> -> vector<8x32xf32>
    %cst_132 = arith.constant dense<0.000000e+00> : vector<8x32xf32>
    %261 = tpu.matmul %259, %91, %cst_132 {dimension_numbers = #tpu.dot_dimension_numbers<[1], [0], [0], [1], [0, 0, 1, 1], [], []>} : vector<8x32xf32>, vector<32x32xf32>, vector<8x32xf32> -> vector<8x32xf32>
    %cst_133 = arith.constant dense<0.000000e+00> : vector<8x32xf32>
    %262 = tpu.matmul %259, %93, %cst_133 {dimension_numbers = #tpu.dot_dimension_numbers<[1], [0], [0], [1], [0, 0, 1, 1], [], []>} : vector<8x32xf32>, vector<32x32xf32>, vector<8x32xf32> -> vector<8x32xf32>
    %263 = arith.addf %262, %96 : vector<8x32xf32>
    %264 = vector.extract_strided_slice %73 {offsets = [48, 0], sizes = [8, 32], strides = [1, 1]} : vector<64x32xf32> to vector<8x32xf32>
    %265 = arith.addf %264, %260 : vector<8x32xf32>
    %266 = arith.negf %265 : vector<8x32xf32>
    %267 = math.exp %266 : vector<8x32xf32>
    %cst_134 = arith.constant 1.000000e+00 : f32
    %268 = vector.broadcast %cst_134 : f32 to vector<8x32xf32>
    %269 = arith.addf %268, %267 : vector<8x32xf32>
    %270 = arith.divf %268, %269 : vector<8x32xf32>
    %271 = vector.extract_strided_slice %80 {offsets = [48, 0], sizes = [8, 32], strides = [1, 1]} : vector<64x32xf32> to vector<8x32xf32>
    %272 = arith.addf %271, %261 : vector<8x32xf32>
    %273 = arith.negf %272 : vector<8x32xf32>
    %274 = math.exp %273 : vector<8x32xf32>
    %cst_135 = arith.constant 1.000000e+00 : f32
    %275 = vector.broadcast %cst_135 : f32 to vector<8x32xf32>
    %276 = arith.addf %275, %274 : vector<8x32xf32>
    %277 = arith.divf %275, %276 : vector<8x32xf32>
    %278 = vector.extract_strided_slice %87 {offsets = [48, 0], sizes = [8, 32], strides = [1, 1]} : vector<64x32xf32> to vector<8x32xf32>
    %279 = arith.mulf %270, %263 : vector<8x32xf32>
    %280 = arith.addf %278, %279 : vector<8x32xf32>
    %281 = math.tanh %280 : vector<8x32xf32>
    %cst_136 = arith.constant 1.000000e+00 : f32
    %282 = vector.broadcast %cst_136 : f32 to vector<8x32xf32>
    %283 = arith.subf %282, %277 : vector<8x32xf32>
    %284 = arith.mulf %283, %281 : vector<8x32xf32>
    %285 = arith.mulf %277, %259 : vector<8x32xf32>
    %286 = arith.addf %284, %285 : vector<8x32xf32>
    %cst_137 = arith.constant dense<0.000000e+00> : vector<8x32xf32>
    %287 = tpu.matmul %286, %89, %cst_137 {dimension_numbers = #tpu.dot_dimension_numbers<[1], [0], [0], [1], [0, 0, 1, 1], [], []>} : vector<8x32xf32>, vector<32x32xf32>, vector<8x32xf32> -> vector<8x32xf32>
    %cst_138 = arith.constant dense<0.000000e+00> : vector<8x32xf32>
    %288 = tpu.matmul %286, %91, %cst_138 {dimension_numbers = #tpu.dot_dimension_numbers<[1], [0], [0], [1], [0, 0, 1, 1], [], []>} : vector<8x32xf32>, vector<32x32xf32>, vector<8x32xf32> -> vector<8x32xf32>
    %cst_139 = arith.constant dense<0.000000e+00> : vector<8x32xf32>
    %289 = tpu.matmul %286, %93, %cst_139 {dimension_numbers = #tpu.dot_dimension_numbers<[1], [0], [0], [1], [0, 0, 1, 1], [], []>} : vector<8x32xf32>, vector<32x32xf32>, vector<8x32xf32> -> vector<8x32xf32>
    %290 = arith.addf %289, %96 : vector<8x32xf32>
    %291 = vector.extract_strided_slice %73 {offsets = [56, 0], sizes = [8, 32], strides = [1, 1]} : vector<64x32xf32> to vector<8x32xf32>
    %292 = arith.addf %291, %287 : vector<8x32xf32>
    %293 = arith.negf %292 : vector<8x32xf32>
    %294 = math.exp %293 : vector<8x32xf32>
    %cst_140 = arith.constant 1.000000e+00 : f32
    %295 = vector.broadcast %cst_140 : f32 to vector<8x32xf32>
    %296 = arith.addf %295, %294 : vector<8x32xf32>
    %297 = arith.divf %295, %296 : vector<8x32xf32>
    %298 = vector.extract_strided_slice %80 {offsets = [56, 0], sizes = [8, 32], strides = [1, 1]} : vector<64x32xf32> to vector<8x32xf32>
    %299 = arith.addf %298, %288 : vector<8x32xf32>
    %300 = arith.negf %299 : vector<8x32xf32>
    %301 = math.exp %300 : vector<8x32xf32>
    %cst_141 = arith.constant 1.000000e+00 : f32
    %302 = vector.broadcast %cst_141 : f32 to vector<8x32xf32>
    %303 = arith.addf %302, %301 : vector<8x32xf32>
    %304 = arith.divf %302, %303 : vector<8x32xf32>
    %305 = vector.extract_strided_slice %87 {offsets = [56, 0], sizes = [8, 32], strides = [1, 1]} : vector<64x32xf32> to vector<8x32xf32>
    %306 = arith.mulf %297, %290 : vector<8x32xf32>
    %307 = arith.addf %305, %306 : vector<8x32xf32>
    %308 = math.tanh %307 : vector<8x32xf32>
    %cst_142 = arith.constant 1.000000e+00 : f32
    %309 = vector.broadcast %cst_142 : f32 to vector<8x32xf32>
    %310 = arith.subf %309, %304 : vector<8x32xf32>
    %311 = arith.mulf %310, %308 : vector<8x32xf32>
    %312 = arith.mulf %304, %286 : vector<8x32xf32>
    %313 = arith.addf %311, %312 : vector<8x32xf32>
    %c0_143 = arith.constant 0 : index
    %c0_144 = arith.constant 0 : index
    %314 = vector.load %arg6[%c0_143, %c0_144] : memref<32x2xf32, #tpu.memory_space<vmem>>, vector<32x2xf32>
    %cst_145 = arith.constant dense<0.000000e+00> : vector<8x2xf32>
    %315 = tpu.matmul %313, %314, %cst_145 {dimension_numbers = #tpu.dot_dimension_numbers<[1], [0], [0], [1], [0, 0, 1, 1], [], []>} : vector<8x32xf32>, vector<32x2xf32>, vector<8x2xf32> -> vector<8x2xf32>
    %c0_146 = arith.constant 0 : index
    %c0_147 = arith.constant 0 : index
    %316 = vector.load %arg7[%c0_146, %c0_147] : memref<1x2xf32, #tpu.memory_space<vmem>>, vector<1x2xf32>
    %317 = vector.broadcast %316 : vector<1x2xf32> to vector<8x2xf32>
    %318 = arith.addf %315, %317 : vector<8x2xf32>
    %319 = vector.extract_strided_slice %318 {offsets = [0, 0], sizes = [2, 2], strides = [1, 1]} : vector<8x2xf32> to vector<2x2xf32>
    %c0_148 = arith.constant 0 : index
    %c0_149 = arith.constant 0 : index
    %320 = vector.load %arg8[%c0_148, %c0_149] : memref<2x2xf32, #tpu.memory_space<vmem>>, vector<2x2xf32>
    tpu.vector_store %arg8[%c0_148, %c0_149], %319 {strides = array<i32>} : memref<2x2xf32, #tpu.memory_space<vmem>>, vector<2x2xf32>,
    return
  }
}

</mosaic_0001>

<bundles_post_ra>
// kernel: gru_discriminator_forward.1
= control target key start
LH: loop header
LB: loop body
LE: loop exit
PB: predicated region body
PF: predicated region fallthrough
CT: control target
= control target key end

     0   :  { %13 = vsyncpa [#allocation5], 0  ;;  %s3972_s0 = inlined_call_operand.vmem [shape: s32[2,8], index: 0, kind: input, shape index: {}]   ;;  %s3973_s1 = inlined_call_operand.vmem [shape: f32[50,32], index: 1, kind: input, shape index: {}]   ;;  %s3974_s2 = inlined_call_operand.vmem [shape: f32[3,32,32], index: 2, kind: input, shape index: {}]   ;;  %s3975_s3 = inlined_call_operand.vmem [shape: f32[3,32,32], index: 3, kind: input, shape index: {}]   ;;  %s3976_s4 = inlined_call_operand.vmem [shape: f32[3,1,32], index: 4, kind: input, shape index: {}]   ;;  %s3977_s5 = inlined_call_operand.vmem [shape: f32[1,32], index: 5, kind: input, shape index: {}]   ;;  %s3978_s6 = inlined_call_operand.vmem [shape: f32[32,2], index: 6, kind: input, shape index: {}]   ;;  %s3979_s7 = inlined_call_operand.vmem [shape: f32[1,2], index: 7, kind: input, shape index: {}]   ;;  %s3980_s8 = inlined_call_operand.hbm [shape: f32[2,2], index: 8, kind: output, shape index: {}]  }
   0x1   :  { %14 = vsyncpa [#allocation4], 0  ;;  %s21_s29 = sshll.u32 %s3972_s0, 4  ;;  %s22_s29 = int_to_ptr.vmem [resolvable:$true] %s21_s29 }
   0x2   :  { %s3366_s30 = scalar_lea.vmem %s22_s29, 32  ;;  %p3371_p1 = scmp.lt.s32.totalorder %s22_s29, %s22_s29 }
   0x3   :  { %p3367_p0 = scmp.ne.s32.totalorder %s22_s29, %s3366_s30  ;;  %p3372_p2 = scmp.lt.s32.totalorder %s3366_s30, %s3366_s30 }
   0x5   :  { %p3373_p3 = por %p3372_p2, %p3371_p1 }
   0x7   :  { %p3374_p4 = pnand %p3373_p3, %p3367_p0 }
   0x9   :  { %3377 = shalt.err (!%p3374_p4)
}
   0xa   :  { %s3404_s9 = smov [#allocation3]  }
   0xb   :  { %24 = dma.vmem_to_smem %s22_s29, 32, %s3404_s9, [#allocation5]  }
   0xc   :  { %3400 = dma.done.wait [#allocation5], 32  }
   0xd   :  { %3401 = vsyncadd [#allocation5], 4294967264 }
   0xe   :  { %42 = sfence }
   0xf   :  { %v2535_v0 = vld [vmem:[%s3974_s2 + $0x20] sm:$0xff]  ;;  %v2536_v1 = vld [vmem:[%s3974_s2 + $0x28] sm:$0xff]  ;;  %v2537_v2 = vld [vmem:[%s3974_s2 + $0x30] sm:$0xff]  ;;  %vm43_vm0 = vcmask 261120   ;;  %v3405_v5 = vmov 0.0   ;;  %s3471_s17 = sld [smem:[#allocation3]] }
  0x10   :  { %v3115_v3 = vpack.c.bf16 %v2536_v1, %v2535_v0  ;;  %v2538_v4 = vld [vmem:[%s3974_s2 + $0x38] sm:$0xff]  ;;  %44 = vst.msk [vmem:[#allocation2] sm:$0xff] %vm43_vm0, %v3405_v5  ;;  %s3473_s18 = sld [smem:[#allocation3 + $0x80]]  ;;  %45 = vst.msk [vmem:[#allocation2 + $0x8] sm:$0xff] %vm43_vm0, %v3405_v5  ;;  %s3489_s19 = sld [smem:[#allocation3 + $0x1]]  ;;  %v125_v7 = vld [vmem:[%s3974_s2] sm:$0xff] }
  0x11   :  { %46 = vst.msk [vmem:[#allocation2 + $0x10] sm:$0xff] %vm43_vm0, %v3405_v5  ;;  %47 = vst.msk [vmem:[#allocation2 + $0x18] sm:$0xff] %vm43_vm0, %v3405_v5  ;;  %v3119_v6 = vpack.c.bf16 %v2538_v4, %v2537_v2  ;;  %s3491_s20 = sld [smem:[#allocation3 + $0x81]]  ;;  %v126_v8 = vld [vmem:[%s3974_s2 + $0x8] sm:$0xff]  ;;  %s3499_s25 = sld [smem:[#allocation3 + $0x2]]  ;;  %v127_v10 = vld [vmem:[%s3974_s2 + $0x10] sm:$0xff] }
  0x12   :  { %48 = vst.msk [vmem:[#allocation2 + $0x20] sm:$0xff] %vm43_vm0, %v3405_v5  ;;  %49 = vst.msk [vmem:[#allocation2 + $0x28] sm:$0xff] %vm43_vm0, %v3405_v5  ;;  %3116 = vmatprep.subr.bf16.mxu1 %v3115_v3  ;;  %s3501_s26 = sld [smem:[#allocation3 + $0x82]]  ;;  %v3107_v9 = vpack.c.bf16 %v126_v8, %v125_v7  ;;  %s3503_s27 = sld [smem:[#allocation3 + $0x3]]  ;;  %v128_v11 = vld [vmem:[%s3974_s2 + $0x18] sm:$0xff]  ;;  %vm55_vm1 = vcmask 253952  }
  0x13   :  { %50 = vst.msk [vmem:[#allocation2 + $0x30] sm:$0xff] %vm43_vm0, %v3405_v5  ;;  %51 = vst.msk [vmem:[#allocation2 + $0x38] sm:$0xff] %vm43_vm0, %v3405_v5  ;;  %3118 = vmatpush3.bf16.msra.mxu1 %v3115_v3  ;;  %s3505_s28 = sld [smem:[#allocation3 + $0x83]]  ;;  %v3111_v12 = vpack.c.bf16 %v128_v11, %v127_v10  ;;  %s3513_s11 = sld [smem:[#allocation3 + $0x4]]  ;;  %v2549_v13 = vld [vmem:[%s3974_s2 + $0x40] sm:$0xff]  ;;  %v2550_v14 = vld [vmem:[%s3974_s2 + $0x48] sm:$0xff] }
  0x14   :  { %3120 = vmatprep.subr.bf16.mxu1 %v3119_v6  ;;  %s3515_s12 = sld [smem:[#allocation3 + $0x84]]  ;;  %3108 = vmatprep.subr.bf16.mxu0 %v3107_v9  ;;  %s3517_s13 = sld [smem:[#allocation3 + $0x5]]  ;;  %v3123_v17 = vpack.c.bf16 %v2550_v14, %v2549_v13  ;;  %v3406_v18 = vmov 0.0|0.0   ;;  %v501_v23 = vld [vmem:[%s3975_s3] sm:$0xff]  ;;  %v502_v26 = vld [vmem:[%s3975_s3 + $0x8] sm:$0xff]  ;;  %v2551_v31 = vld [vmem:[%s3974_s2 + $0x50] sm:$0xff] }
  0x15   :  { %s3519_s0 = sld [smem:[#allocation3 + $0x85]]  ;;  %s53_s24 = scalar_lea.vmem %s3973_s1, %s3471_s17  ;;  %3110 = vmatpush3.bf16.msra.mxu0 %v3107_v9  ;;  %v2552_v32 = vld [vmem:[%s3974_s2 + $0x58] sm:$0xff]  ;;  %v3602_v33 = vpack.c.bf16 %v502_v26, %v501_v23  ;;  %v503_v35 = vld [vmem:[%s3975_s3 + $0x10] sm:$0xff]  ;;  %v2563_v49 = vld [vmem:[%s3975_s3 + $0x20] sm:$0xff]  ;;  %vm3407_vm2 = vmmov 0   ;;  %vm2478_vm3 = vcmask 9216  }
  0x16   :  { %s58_s9 = scalar_lea.vmem %s3973_s1, %s3473_s18  ;;  %v54_v15 = vld [vmem:[%s53_s24] sm:$0x1]  ;;  %s62_s15 = scalar_lea.vmem %s3973_s1, %s3489_s19  ;;  %3112 = vmatprep.subr.bf16.mxu0 %v3111_v12  ;;  %v504_v36 = vld [vmem:[%s3975_s3 + $0x18] sm:$0xff]  ;;  %v3127_v38 = vpack.c.bf16 %v2552_v32, %v2551_v31  ;;  %v2564_v50 = vld [vmem:[%s3975_s3 + $0x28] sm:$0xff] }
  0x17   :  { %3122 = vmatpush3.bf16.msra.mxu1 %v3119_v6  ;;  %v59_v16 = vld [vmem:[%s58_s9] sm:$0x1]  ;;  %s66_s22 = scalar_lea.vmem %s3973_s1, %s3491_s20  ;;  %56 = vst.msk [vmem:[#allocation2] sm:$0x1] %vm55_vm1, %v54_v15  ;;  %s70_s19 = scalar_lea.vmem %s3973_s1, %s3499_s25  ;;  %v3618_v41 = vpack.c.bf16 %v504_v36, %v503_v35  ;;  %v2568_v53 = vld [vmem:[%s3975_s3 + $0x48] sm:$0xff]  ;;  %v3667_v54 = vpack.c.bf16 %v2564_v50, %v2563_v49  ;;  %v2565_v55 = vld [vmem:[%s3975_s3 + $0x30] sm:$0xff] }
  0x18   :  { %60 = vst.msk [vmem:[#allocation2 + $0x1] sm:$0x1] %vm55_vm1, %v59_v16  ;;  %3131 = vmatprep.subr.bf16.mxu1 %v3406_v18  ;;  %v63_v19 = vld [vmem:[%s62_s15] sm:$0x1]  ;;  %s74_s24 = scalar_lea.vmem %s3973_s1, %s3501_s26  ;;  %s78_s9 = scalar_lea.vmem %s3973_s1, %s3503_s27  ;;  %v2566_v56 = vld [vmem:[%s3975_s3 + $0x38] sm:$0xff]  ;;  %v2569_v58 = vld [vmem:[%s3975_s3 + $0x50] sm:$0xff] }
  0x19   :  { %v67_v20 = vld [vmem:[%s66_s22] sm:$0x1]  ;;  %64 = vst.msk [vmem:[#allocation2 + $0x8] sm:$0x1] %vm55_vm1, %v63_v19  ;;  %s82_s25 = scalar_lea.vmem %s3973_s1, %s3505_s28  ;;  %3114 = vmatpush3.bf16.msra.mxu0 %v3111_v12  ;;  %s86_s27 = scalar_lea.vmem %s3973_s1, %s3513_s11  ;;  %v2570_v59 = vld [vmem:[%s3975_s3 + $0x58] sm:$0xff]  ;;  %v3687_v60 = vpack.c.bf16 %v2566_v56, %v2565_v55 }
  0x1a   :  { %68 = vst.msk [vmem:[#allocation2 + $0x9] sm:$0x1] %vm55_vm1, %v67_v20  ;;  %v71_v21 = vld [vmem:[%s70_s19] sm:$0x1]  ;;  %s90_s18 = scalar_lea.vmem %s3973_s1, %s3515_s12  ;;  %3124 = vmatprep.subr.bf16.mxu0 %v3123_v17  ;;  %s2522_s12 = sld [smem:[#allocation3 + $0x6]]  ;;  %v3693_v61 = vpack.c.bf16 %v2570_v59, %v2569_v58 }
  0x1b   :  { %v75_v22 = vld [vmem:[%s74_s24] sm:$0x1]  ;;  %72 = vst.msk [vmem:[#allocation2 + $0x10] sm:$0x1] %vm55_vm1, %v71_v21  ;;  %s94_s24 = scalar_lea.vmem %s3973_s1, %s3517_s13  ;;  %s98_s30 = scalar_lea.vmem %s3973_s1, %s3519_s0  ;;  %v2540_v62 = vld [vmem:[%s3976_s4 + $0x1] ss:$0 sm:$0xff] }
  0x1c   :  { %76 = vst.msk [vmem:[#allocation2 + $0x11] sm:$0x1] %vm55_vm1, %v75_v22  ;;  %v79_v24 = vld [vmem:[%s78_s9] sm:$0x1]  ;;  %s2523_s9 = sld [smem:[#allocation3 + $0x86]]  ;;  %s3594_s10 = sld [smem:[#allocation3 + $0x7]] }
  0x1d   :  { %v83_v25 = vld [vmem:[%s82_s25] sm:$0x1]  ;;  %80 = vst.msk [vmem:[#allocation2 + $0x18] sm:$0x1] %vm55_vm1, %v79_v24  ;;  %s3604_s15 = sld [smem:[#allocation3 + $0x87]]  ;;  %s3408_s14 = smov [#allocation6]  }
  0x1e   :  { %84 = vst.msk [vmem:[#allocation2 + $0x19] sm:$0x1] %vm55_vm1, %v83_v25  ;;  %v87_v27 = vld [vmem:[%s86_s27] sm:$0x1]  ;;  %v2554_v32 = vld [vmem:[%s3976_s4 + $0x2] ss:$0 sm:$0xff] }
  0x1f   :  { %v91_v28 = vld [vmem:[%s90_s18] sm:$0x1]  ;;  %88 = vst.msk [vmem:[#allocation2 + $0x20] sm:$0x1] %vm55_vm1, %v87_v27  ;;  %s2486_s0 = sshll.u32 %s3408_s14, 4  ;;  %s2487_s0 = int_to_ptr.vmem [resolvable:$true] %s2486_s0 }
  0x20   :  { %92 = vst.msk [vmem:[#allocation2 + $0x21] sm:$0x1] %vm55_vm1, %v91_v28  ;;  %v95_v29 = vld [vmem:[%s94_s24] sm:$0x1]  ;;  %s102_s17 = scalar_lea.vmem %s3973_s1, %s2522_s12  ;;  %s3378_s25 = scalar_lea.vmem %s2487_s0, 32 }
  0x21   :  { %v99_v30 = vld [vmem:[%s98_s30] sm:$0x1]  ;;  %96 = vst.msk [vmem:[#allocation2 + $0x28] sm:$0x1] %vm55_vm1, %v95_v29  ;;  %v118_v37 = vld [vmem:[#allocation2 + $0x8] sm:$0xff]  ;;  %p3379_p5 = scmp.ne.s32.totalorder %s2487_s0, %s3378_s25  ;;  %p3383_p6 = scmp.lt.s32.totalorder %s2487_s0, %s2487_s0 }
  0x22   :  { %100 = vst.msk [vmem:[#allocation2 + $0x29] sm:$0x1] %vm55_vm1, %v99_v30  ;;  %v117_v34 = vld [vmem:[#allocation2] sm:$0xff]  ;;  %s106_s19 = scalar_lea.vmem %s3973_s1, %s2523_s9  ;;  %s110_s24 = scalar_lea.vmem %s3973_s1, %s3594_s10 }
  0x23   :  { %2800 = vmatprep.mubr.msk.f32.mxu1 %vm43_vm0, %v117_v34  ;;  %2780 = vmatprep.mubr.msk.f32.mxu0 %vm43_vm0, %v117_v34  ;;  %v119_v39 = vld [vmem:[#allocation2 + $0x10] sm:$0xff]  ;;  %v103_v43 = vld [vmem:[%s102_s17] sm:$0x1]  ;;  %s114_s30 = scalar_lea.vmem %s3973_s1, %s3604_s15  ;;  %p3384_p7 = scmp.lt.s32.totalorder %s3378_s25, %s3378_s25 }
  0x24   :  { %2801 = vmatmul.mubr.msk.f32.vlgmr.msra.gmra.mrb[0].mxu1 %vm43_vm0, %v118_v37  ;;  %2781 = vmatmul.mubr.msk.f32.vlgmr.msra.gmra.mrb[0].mxu0 %vm43_vm0, %v118_v37  ;;  %104 = vst.msk [vmem:[#allocation2 + $0x30] sm:$0x1] %vm55_vm1, %v103_v43  ;;  %v107_v44 = vld [vmem:[%s106_s19] sm:$0x1] }
  0x25   :  { %3133 = vmatpush3.bf16.msra.mxu1 %v3602_v33  ;;  %2803 = vmatprep.mubr.msk.f32.mxu1 %vm43_vm0, %v119_v39  ;;  %v120_v40 = vld [vmem:[#allocation2 + $0x18] sm:$0xff]  ;;  %v111_v45 = vld [vmem:[%s110_s24] sm:$0x1]  ;;  %108 = vst.msk [vmem:[#allocation2 + $0x31] sm:$0x1] %vm55_vm1, %v107_v44  ;;  %p3385_p8 = por %p3384_p7, %p3383_p6 }
  0x26   :  { %3134 = vmatprep.subr.bf16.mxu1 %v3406_v18  ;;  %3126 = vmatpush3.bf16.msra.mxu0 %v3123_v17  ;;  %112 = vst.msk [vmem:[#allocation2 + $0x38] sm:$0x1] %vm55_vm1, %v111_v45  ;;  %v115_v46 = vld [vmem:[%s114_s30] sm:$0x1] }
  0x27   :  { %v121_v42 = vld [vmem:[#allocation2 + $0x20] sm:$0xff]  ;;  %2783 = vmatprep.mubr.msk.f32.mxu0 %vm43_vm0, %v119_v39  ;;  %3128 = vmatprep.subr.bf16.mxu0 %v3127_v38  ;;  %116 = vst.msk [vmem:[#allocation2 + $0x39] sm:$0x1] %vm55_vm1, %v115_v46  ;;  %p3386_p9 = pnand %p3385_p8, %p3379_p5 }
  0x28   :  { %2804 = vmatmul.mubr.msk.f32.gmra.mrb[2].mxu1 %vm43_vm0, %v120_v40  ;;  %2784 = vmatmul.mubr.msk.f32.gmra.mrb[2].mxu0 %vm43_vm0, %v120_v40  ;;  %v2567_v52 = vld [vmem:[%s3975_s3 + $0x40] sm:$0xff] }
  0x29   :  { %2806 = vmatprep.mubr.msk.f32.mxu1 %vm43_vm0, %v121_v42  ;;  %v122_v47 = vld [vmem:[#allocation2 + $0x28] sm:$0xff]  ;;  %3136 = vmatpush3.bf16.msra.mxu1 %v3618_v41  ;;  %v3676_v57 = vpack.c.bf16 %v2568_v53, %v2567_v52  ;;  %v2526_v63 = vld [vmem:[%s3976_s4] ss:$0 sm:$0xff] }
  0x2a   :  { %3137 = vmatprep.subr.bf16.mxu1 %v3406_v18  ;;  %2786 = vmatprep.mubr.msk.f32.mxu0 %vm43_vm0, %v121_v42 }
  0x2b   :  { %3130 = vmatpush3.bf16.msra.mxu0 %v3127_v38 }
  0x2c   :  { %2807 = vmatmul.mubr.msk.f32.gmra.mrb[4].mxu1 %vm43_vm0, %v122_v47  ;;  %2787 = vmatmul.mubr.msk.f32.gmra.mrb[4].mxu0 %vm43_vm0, %v122_v47  ;;  %v123_v48 = vld [vmem:[#allocation2 + $0x30] sm:$0xff] }
  0x2d   :  { %3143 = vmatprep.subr.bf16.mxu0 %v3406_v18  ;;  %2809 = vmatprep.mubr.msk.f32.mxu1 %vm43_vm0, %v123_v48 }
  0x2e   :  { %v124_v51 = vld [vmem:[#allocation2 + $0x38] sm:$0xff]  ;;  %2789 = vmatprep.mubr.msk.f32.mxu0 %vm43_vm0, %v123_v48 }
  0x30   :  { %2810 = vmatmul.mubr.msk.f32.gmra.mrb[6].mxu1 %vm43_vm0, %v124_v51  ;;  %2790 = vmatmul.mubr.msk.f32.gmra.mrb[6].mxu0 %vm43_vm0, %v124_v51 }
  0x31   :  { %2840 = vmatprep.mubr.msk.f32.mxu1 %vm3407_vm2, %v3405_v5  ;;  %2820 = vmatprep.mubr.msk.f32.mxu0 %vm43_vm0, %v117_v34 }
  0x34   :  { %2841 = vmatmul.mubr.f32.vlgmr.msra.gmra.mrb[8].mxu1 %v3405_v5  ;;  %2821 = vmatmul.mubr.msk.f32.vlgmr.msra.gmra.mrb[8].mxu0 %vm43_vm0, %v118_v37 }
  0x35   :  { %3139 = vmatpush3.bf16.msra.mxu1 %v3667_v54  ;;  %2851 = vmatprep.mubr.msk.f32.mxu1 %vm3407_vm2, %v3405_v5 }
  0x36   :  { %3140 = vmatprep.subr.bf16.mxu1 %v3406_v18  ;;  %3145 = vmatpush3.bf16.msra.mxu0 %v3676_v57 }
  0x37   :  { %2823 = vmatprep.mubr.msk.f32.mxu0 %vm43_vm0, %v119_v39  ;;  %3146 = vmatprep.subr.bf16.mxu0 %v3406_v18 }
  0x38   :  { %2824 = vmatmul.mubr.msk.f32.gmra.mrb[10].mxu0 %vm43_vm0, %v120_v40 }
  0x39   :  { %3142 = vmatpush3.bf16.msra.mxu1 %v3687_v60  ;;  %2826 = vmatprep.mubr.msk.f32.mxu0 %vm43_vm0, %v121_v42 }
  0x3a   :  { %3148 = vmatpush3.bf16.msra.mxu0 %v3693_v61  ;;  %3149 = vmatprep.subr.bf16.mxu1 %v3406_v18 }
  0x3b   :  { %3155 = vmatprep.subr.bf16.mxu0 %v3406_v18 }
  0x3c   :  { %2852 = vmatmul.mubr.f32.vlgmr.msra.gmra.mrb[10].mxu1 %v3405_v5  ;;  %2827 = vmatmul.mubr.msk.f32.gmra.mrb[12].mxu0 %vm43_vm0, %v122_v47 }
  0x3d   :  { %2829 = vmatprep.mubr.msk.f32.mxu0 %vm43_vm0, %v123_v48  ;;  %3151 = vmatpush3.bf16.msra.mxu1 %v3602_v33 }
  0x3e   :  { %3152 = vmatprep.subr.bf16.mxu1 %v3406_v18  ;;  %2873 = vmatprep.mubr.msk.f32.mxu1 %vm3407_vm2, %v3405_v5 }
  0x40   :  { %2830 = vmatmul.mubr.msk.f32.gmra.mrb[14].mxu0 %vm43_vm0, %v124_v51 }
  0x41   :  { %2862 = vmatprep.mubr.msk.f32.mxu0 %vm3407_vm2, %v3405_v5  ;;  %3154 = vmatpush3.bf16.msra.mxu1 %v3618_v41 }
  0x42   :  { %3161 = vmatprep.subr.bf16.mxu1 %v3406_v18 }
  0x44   :  { %2863 = vmatmul.mubr.f32.vlgmr.msra.gmra.mrb[16].mxu0 %v3405_v5 }
  0x45   :  { %3157 = vmatpush3.bf16.msra.mxu0 %v3667_v54  ;;  %2884 = vmatprep.mubr.msk.f32.mxu0 %vm3407_vm2, %v3405_v5 }
  0x46   :  { %3158 = vmatprep.subr.bf16.mxu0 %v3406_v18 }
  0x49   :  { %3160 = vmatpush3.bf16.msra.mxu0 %v3687_v60 }
  0x4a   :  { %3167 = vmatprep.subr.bf16.mxu0 %v3406_v18 }
  0xf7   :  { %v2802_v0 = vpop.f32.mrb[0].mxu1  ;;  %v2782_v1 = vpop.f32.mrb[0].mxu0 }
  0xf8   :  { %v3728_v2 = vadd.f32 %v2802_v0, %v2540_v62  ;;  %v344_v3 = vpop.f32.mrb[1].mxu1  ;;  %v3730_v4 = vadd.f32 %v2782_v1, %v2526_v63  ;;  %v226_v6 = vpop.f32.mrb[1].mxu0 }
  0xf9   :  { %v227_v34 = vadd.f32 %v2526_v63, %v226_v6  ;;  %v345_v47 = vadd.f32 %v2540_v62, %v344_v3 }
  0xfb   :  { %v2805_v7 = vpop.f32.mrb[2].mxu1  ;;  %v2785_v8 = vpop.f32.mrb[2].mxu0 }
  0xfc   :  { %v3732_v9 = vadd.f32 %v2805_v7, %v2540_v62  ;;  %v354_v10 = vpop.f32.mrb[3].mxu1  ;;  %v3734_v11 = vadd.f32 %v2785_v8, %v2526_v63  ;;  %v236_v12 = vpop.f32.mrb[3].mxu0  ;;  %v3776_v7 = vld [vmem:[%s3977_s5] ss:$0 sm:$0xff] }
  0xfd   :  { %v3736_v13 = vadd.f32 %v2540_v62, %v354_v10  ;;  %v3738_v14 = vadd.f32 %v2526_v63, %v236_v12 }
  0xff   :  { %v2808_v15 = vpop.f32.mrb[4].mxu1  ;;  %v2788_v16 = vpop.f32.mrb[4].mxu0 }
 0x100   :  { %v3740_v17 = vadd.f32 %v2808_v15, %v2540_v62  ;;  %v364_v19 = vpop.f32.mrb[5].mxu1  ;;  %v3742_v20 = vadd.f32 %v2788_v16, %v2526_v63  ;;  %v246_v21 = vpop.f32.mrb[5].mxu0 }
 0x101   :  { %v3744_v22 = vadd.f32 %v2540_v62, %v364_v19  ;;  %v3746_v23 = vadd.f32 %v2526_v63, %v246_v21 }
 0x103   :  { %v2811_v24 = vpop.f32.mrb[6].mxu1  ;;  %v2791_v25 = vpop.f32.mrb[6].mxu0 }
 0x104   :  { %v3748_v26 = vadd.f32 %v2811_v24, %v2540_v62  ;;  %v374_v27 = vpop.f32.mrb[7].mxu1  ;;  %v3750_v28 = vadd.f32 %v2791_v25, %v2526_v63  ;;  %v256_v29 = vpop.f32.mrb[7].mxu0 }
 0x105   :  { %v3752_v30 = vadd.f32 %v2540_v62, %v374_v27  ;;  %v3754_v31 = vadd.f32 %v2526_v63, %v256_v29 }
 0x107   :  { %v591_v35 = vpop.f32.mrb[8].mxu1  ;;  %v2822_v36 = vpop.f32.mrb[8].mxu0 }
 0x108   :  { %v735_v37 = vadd.f32 %v591_v35, %v227_v34  ;;  %v2842_v38 = vpop.f32.mrb[9].mxu1  ;;  %v3759_v39 = vadd.f32 %v2822_v36, %v2554_v32  ;;  %v462_v40 = vpop.f32.mrb[9].mxu0 }
 0x109   :  { %v463_v16 = vadd.f32 %v2554_v32, %v462_v40 }
 0x10a   :  { %v2572_v42 = vmul.f32 -1.442695, %v735_v37 }
 0x10b   :  { %v2825_v43 = vpop.f32.mrb[10].mxu0 }
 0x10c   :  { %3286 = vpow2.f32 %v2572_v42  ;;  %v3761_v44 = vadd.f32 %v2825_v43, %v2554_v32  ;;  %v472_v45 = vpop.f32.mrb[11].mxu0 }
 0x10d   :  { %v3763_v46 = vadd.f32 %v2554_v32, %v472_v45 }
 0x10f   :  { %v661_v48 = vpop.f32.mrb[10].mxu1  ;;  %v2828_v49 = vpop.f32.mrb[12].mxu0 }
 0x110   :  { %v742_v50 = vadd.f32 %v661_v48, %v345_v47  ;;  %v2853_v51 = vpop.f32.mrb[11].mxu1  ;;  %v3765_v52 = vadd.f32 %v2828_v49, %v2554_v32  ;;  %v482_v53 = vpop.f32.mrb[13].mxu0 }
 0x111   :  { %v3767_v55 = vadd.f32 %v2554_v32, %v482_v53 }
 0x112   :  { %v2573_v56 = vmul.f32 -1.442695, %v742_v50 }
 0x113   :  { %v2831_v58 = vpop.f32.mrb[14].mxu0 }
 0x114   :  { %3288 = vpow2.f32 %v2573_v56  ;;  %v3769_v59 = vadd.f32 %v2831_v58, %v2554_v32  ;;  %v492_v63 = vpop.f32.mrb[15].mxu0 }
 0x115   :  { %v3771_v0 = vadd.f32 %v2554_v32, %v492_v63 }
 0x116   :  { %v3287_v1 = vpop.eup %3286 }
 0x117   :  { %v739_v6 = vadd.f32 1.0, %v3287_v1  ;;  %v731_v62 = vpop.f32.mrb[16].mxu0 }
 0x118   :  { %v2864_v3 = vpop.f32.mrb[17].mxu0  ;;  %v732_v12 = vadd.f32 %v3776_v7, %v731_v62 }
 0x119   :  { %3290 = vrcp.f32 %v739_v6 }
 0x11e   :  { %v3289_v8 = vpop.eup %3288 }
 0x11f   :  { %v746_v10 = vadd.f32 1.0, %v3289_v8 }
 0x121   :  { %3292 = vrcp.f32 %v746_v10 }
 0x123   :  { %v3291_v15 = vpop.eup %3290 }
 0x124   :  { %v749_v19 = vmul.f32 %v3291_v15, %v732_v12 }
 0x126   :  { %v750_v21 = vadd.f32 %v749_v19, %v463_v16 }
 0x128   :  { %3294 = vtanh.f32 %v750_v21 }
 0x12b   :  { %v3293_v24 = vpop.eup %3292 }
 0x12c   :  { %v752_v25 = vsub.f32 1.0, %v3293_v24  ;;  %v754_v34 = vmul.f32 0.0, %v3293_v24 }
 0x132   :  { %v3295_v27 = vpop.eup %3294 }
 0x133   :  { %v753_v29 = vmul.f32 %v3295_v27, %v752_v25 }
 0x135   :  { %v755_v35 = vadd.f32 %v754_v34, %v753_v29 }
 0x137   :  { %2874 = vmatmul.mubr.msk.f32.vlgmr.msra.gmra.mrb[12].mxu1 %vm43_vm0, %v755_v35  ;;  %2885 = vmatmul.mubr.msk.f32.vlgmr.msra.gmra.mrb[18].mxu0 %vm43_vm0, %v755_v35 }
 0x138   :  { %3163 = vmatpush3.bf16.msra.mxu1 %v3676_v57  ;;  %2895 = vmatprep.mubr.msk.f32.mxu1 %vm3407_vm2, %v3405_v5 }
 0x139   :  { %3164 = vmatprep.subr.bf16.mxu1 %v3406_v18  ;;  %3169 = vmatpush3.bf16.msra.mxu0 %v3602_v33 }
 0x13a   :  { %3170 = vmatprep.subr.bf16.mxu0 %v3406_v18  ;;  %2906 = vmatprep.mubr.msk.f32.mxu0 %vm3407_vm2, %v3405_v5 }
 0x13c   :  { %3166 = vmatpush3.bf16.msra.mxu1 %v3693_v61 }
 0x13d   :  { %3173 = vmatprep.subr.bf16.mxu1 %v3406_v18  ;;  %3172 = vmatpush3.bf16.msra.mxu0 %v3618_v41 }
 0x13e   :  { %3179 = vmatprep.subr.bf16.mxu0 %v3406_v18 }
 0x13f   :  { %2896 = vmatmul.mubr.msk.f32.vlgmr.msra.gmra.mrb[14].mxu1 %vm43_vm0, %v755_v35 }
 0x140   :  { %3175 = vmatpush3.bf16.msra.mxu1 %v3667_v54  ;;  %2917 = vmatprep.mubr.msk.f32.mxu1 %vm3407_vm2, %v3405_v5 }
 0x141   :  { %3176 = vmatprep.subr.bf16.mxu1 %v3406_v18 }
 0x144   :  { %3178 = vmatpush3.bf16.msra.mxu1 %v3687_v60 }
 0x145   :  { %3185 = vmatprep.subr.bf16.mxu1 %v3406_v18 }
 0x20a   :  { %v825_v32 = vpop.f32.mrb[12].mxu1  ;;  %v895_v36 = vpop.f32.mrb[18].mxu0 }
 0x20b   :  { %v969_v37 = vadd.f32 %v825_v32, %v3730_v4  ;;  %v976_v38 = vadd.f32 %v895_v36, %v3728_v2  ;;  %v2875_v40 = vpop.f32.mrb[13].mxu1  ;;  %v2886_v42 = vpop.f32.mrb[19].mxu0 }
 0x20d   :  { %v2577_v43 = vmul.f32 -1.442695, %v969_v37  ;;  %v2578_v45 = vmul.f32 -1.442695, %v976_v38 }
 0x20f   :  { %3296 = vpow2.f32 %v2577_v43 }
 0x210   :  { %3298 = vpow2.f32 %v2578_v45 }
 0x212   :  { %v965_v47 = vpop.f32.mrb[14].mxu1 }
 0x213   :  { %v2897_v48 = vpop.f32.mrb[15].mxu1  ;;  %v966_v56 = vadd.f32 %v3776_v7, %v965_v47 }
 0x219   :  { %v3297_v49 = vpop.eup %3296 }
 0x21a   :  { %v973_v50 = vadd.f32 1.0, %v3297_v49  ;;  %v3299_v51 = vpop.eup %3298 }
 0x21b   :  { %v980_v53 = vadd.f32 1.0, %v3299_v51 }
 0x21c   :  { %3300 = vrcp.f32 %v973_v50 }
 0x21d   :  { %3302 = vrcp.f32 %v980_v53 }
 0x226   :  { %v3301_v58 = vpop.eup %3300 }
 0x227   :  { %v983_v4 = vmul.f32 %v3301_v58, %v966_v56  ;;  %v3303_v63 = vpop.eup %3302 }
 0x228   :  { %v986_v1 = vsub.f32 1.0, %v3303_v63  ;;  %v988_v3 = vmul.f32 %v3303_v63, %v755_v35 }
 0x229   :  { %v984_v2 = vadd.f32 %v983_v4, %v3759_v39 }
 0x22b   :  { %3304 = vtanh.f32 %v984_v2 }
 0x235   :  { %v3305_v6 = vpop.eup %3304 }
 0x236   :  { %v987_v62 = vmul.f32 %v3305_v6, %v986_v1 }
 0x238   :  { %v989_v8 = vadd.f32 %v988_v3, %v987_v62 }
 0x23a   :  { %2907 = vmatmul.mubr.msk.f32.vlgmr.msra.gmra.mrb[20].mxu0 %vm43_vm0, %v989_v8  ;;  %2918 = vmatmul.mubr.msk.f32.vlgmr.msra.gmra.mrb[16].mxu1 %vm43_vm0, %v989_v8 }
 0x23b   :  { %3181 = vmatpush3.bf16.msra.mxu0 %v3676_v57  ;;  %2928 = vmatprep.mubr.msk.f32.mxu0 %vm3407_vm2, %v3405_v5 }
 0x23c   :  { %3182 = vmatprep.subr.bf16.mxu0 %v3406_v18  ;;  %3187 = vmatpush3.bf16.msra.mxu1 %v3602_v33 }
 0x23d   :  { %3188 = vmatprep.subr.bf16.mxu1 %v3406_v18  ;;  %2939 = vmatprep.mubr.msk.f32.mxu1 %vm3407_vm2, %v3405_v5 }
 0x23f   :  { %3184 = vmatpush3.bf16.msra.mxu0 %v3693_v61 }
 0x240   :  { %3191 = vmatprep.subr.bf16.mxu0 %v3406_v18  ;;  %3190 = vmatpush3.bf16.msra.mxu1 %v3618_v41 }
 0x241   :  { %3197 = vmatprep.subr.bf16.mxu1 %v3406_v18 }
 0x242   :  { %2929 = vmatmul.mubr.msk.f32.vlgmr.msra.gmra.mrb[22].mxu0 %vm43_vm0, %v989_v8 }
 0x243   :  { %3193 = vmatpush3.bf16.msra.mxu0 %v3667_v54  ;;  %2950 = vmatprep.mubr.msk.f32.mxu0 %vm3407_vm2, %v3405_v5 }
 0x244   :  { %3194 = vmatprep.subr.bf16.mxu0 %v3406_v18 }
 0x247   :  { %3196 = vmatpush3.bf16.msra.mxu0 %v3687_v60 }
 0x248   :  { %3203 = vmatprep.subr.bf16.mxu0 %v3406_v18 }
 0x30d   :  { %v1059_v39 = vpop.f32.mrb[20].mxu0  ;;  %v1129_v10 = vpop.f32.mrb[16].mxu1 }
 0x30e   :  { %v1203_v12 = vadd.f32 %v1059_v39, %v3738_v14  ;;  %v1210_v15 = vadd.f32 %v1129_v10, %v3736_v13  ;;  %v2908_v16 = vpop.f32.mrb[21].mxu0  ;;  %v2919_v19 = vpop.f32.mrb[17].mxu1 }
 0x310   :  { %v2582_v21 = vmul.f32 -1.442695, %v1203_v12  ;;  %v2583_v24 = vmul.f32 -1.442695, %v1210_v15 }
 0x312   :  { %3306 = vpow2.f32 %v2582_v21 }
 0x313   :  { %3308 = vpow2.f32 %v2583_v24 }
 0x315   :  { %v1199_v25 = vpop.f32.mrb[22].mxu0 }
 0x316   :  { %v2930_v27 = vpop.f32.mrb[23].mxu0  ;;  %v1200_v36 = vadd.f32 %v3776_v7, %v1199_v25 }
 0x31c   :  { %v3307_v29 = vpop.eup %3306 }
 0x31d   :  { %v1207_v34 = vadd.f32 1.0, %v3307_v29  ;;  %v3309_v35 = vpop.eup %3308 }
 0x31e   :  { %v1214_v32 = vadd.f32 1.0, %v3309_v35 }
 0x31f   :  { %3310 = vrcp.f32 %v1207_v34 }
 0x320   :  { %3312 = vrcp.f32 %v1214_v32 }
 0x329   :  { %v3311_v37 = vpop.eup %3310 }
 0x32a   :  { %v1217_v14 = vmul.f32 %v3311_v37, %v1200_v36  ;;  %v3313_v38 = vpop.eup %3312 }
 0x32b   :  { %v1220_v40 = vsub.f32 1.0, %v3313_v38  ;;  %v1222_v45 = vmul.f32 %v3313_v38, %v989_v8 }
 0x32c   :  { %v1218_v13 = vadd.f32 %v1217_v14, %v3763_v46 }
 0x32e   :  { %3314 = vtanh.f32 %v1218_v13 }
 0x338   :  { %v3315_v42 = vpop.eup %3314 }
 0x339   :  { %v1221_v43 = vmul.f32 %v3315_v42, %v1220_v40 }
 0x33b   :  { %v1223_v47 = vadd.f32 %v1222_v45, %v1221_v43 }
 0x33d   :  { %2940 = vmatmul.mubr.msk.f32.vlgmr.msra.gmra.mrb[18].mxu1 %vm43_vm0, %v1223_v47  ;;  %2951 = vmatmul.mubr.msk.f32.vlgmr.msra.gmra.mrb[24].mxu0 %vm43_vm0, %v1223_v47 }
 0x33e   :  { %3199 = vmatpush3.bf16.msra.mxu1 %v3676_v57  ;;  %2961 = vmatprep.mubr.msk.f32.mxu1 %vm3407_vm2, %v3405_v5 }
 0x33f   :  { %3200 = vmatprep.subr.bf16.mxu1 %v3406_v18  ;;  %3205 = vmatpush3.bf16.msra.mxu0 %v3602_v33 }
 0x340   :  { %3206 = vmatprep.subr.bf16.mxu0 %v3406_v18  ;;  %2972 = vmatprep.mubr.msk.f32.mxu0 %vm3407_vm2, %v3405_v5 }
 0x342   :  { %3202 = vmatpush3.bf16.msra.mxu1 %v3693_v61 }
 0x343   :  { %3209 = vmatprep.subr.bf16.mxu1 %v3406_v18  ;;  %3208 = vmatpush3.bf16.msra.mxu0 %v3618_v41 }
 0x344   :  { %3215 = vmatprep.subr.bf16.mxu0 %v3406_v18 }
 0x345   :  { %2962 = vmatmul.mubr.msk.f32.vlgmr.msra.gmra.mrb[20].mxu1 %vm43_vm0, %v1223_v47 }
 0x346   :  { %3211 = vmatpush3.bf16.msra.mxu1 %v3667_v54  ;;  %2983 = vmatprep.mubr.msk.f32.mxu1 %vm3407_vm2, %v3405_v5 }
 0x347   :  { %3212 = vmatprep.subr.bf16.mxu1 %v3406_v18 }
 0x34a   :  { %3214 = vmatpush3.bf16.msra.mxu1 %v3687_v60 }
 0x34b   :  { %3221 = vmatprep.subr.bf16.mxu1 %v3406_v18 }
 0x410   :  { %v1293_v46 = vpop.f32.mrb[18].mxu1  ;;  %v1363_v48 = vpop.f32.mrb[24].mxu0 }
 0x411   :  { %v1437_v49 = vadd.f32 %v1293_v46, %v3734_v11  ;;  %v1444_v50 = vadd.f32 %v1363_v48, %v3732_v9  ;;  %v2941_v51 = vpop.f32.mrb[19].mxu1  ;;  %v2952_v53 = vpop.f32.mrb[25].mxu0 }
 0x413   :  { %v2587_v56 = vmul.f32 -1.442695, %v1437_v49  ;;  %v2588_v58 = vmul.f32 -1.442695, %v1444_v50 }
 0x415   :  { %3316 = vpow2.f32 %v2587_v56 }
 0x416   :  { %3318 = vpow2.f32 %v2588_v58 }
 0x418   :  { %v1433_v4 = vpop.f32.mrb[20].mxu1 }
 0x419   :  { %v2963_v2 = vpop.f32.mrb[21].mxu1  ;;  %v1434_v3 = vadd.f32 %v3776_v7, %v1433_v4 }
 0x41f   :  { %v3317_v63 = vpop.eup %3316 }
 0x420   :  { %v1441_v1 = vadd.f32 1.0, %v3317_v63  ;;  %v3319_v6 = vpop.eup %3318 }
 0x421   :  { %v1448_v62 = vadd.f32 1.0, %v3319_v6 }
 0x422   :  { %3320 = vrcp.f32 %v1441_v1 }
 0x423   :  { %3322 = vrcp.f32 %v1448_v62 }
 0x42c   :  { %v3321_v8 = vpop.eup %3320 }
 0x42d   :  { %v1451_v11 = vmul.f32 %v3321_v8, %v1434_v3  ;;  %v3323_v39 = vpop.eup %3322 }
 0x42e   :  { %v1454_v10 = vsub.f32 1.0, %v3323_v39  ;;  %v1456_v16 = vmul.f32 %v3323_v39, %v1223_v47 }
 0x42f   :  { %v1452_v9 = vadd.f32 %v1451_v11, %v3761_v44 }
 0x431   :  { %3324 = vtanh.f32 %v1452_v9 }
 0x43b   :  { %v3325_v12 = vpop.eup %3324 }
 0x43c   :  { %v1455_v15 = vmul.f32 %v3325_v12, %v1454_v10 }
 0x43e   :  { %v1457_v19 = vadd.f32 %v1456_v16, %v1455_v15 }
 0x440   :  { %2973 = vmatmul.mubr.msk.f32.vlgmr.msra.gmra.mrb[26].mxu0 %vm43_vm0, %v1457_v19  ;;  %2984 = vmatmul.mubr.msk.f32.vlgmr.msra.gmra.mrb[22].mxu1 %vm43_vm0, %v1457_v19 }
 0x441   :  { %3217 = vmatpush3.bf16.msra.mxu0 %v3676_v57  ;;  %2994 = vmatprep.mubr.msk.f32.mxu0 %vm3407_vm2, %v3405_v5 }
 0x442   :  { %3218 = vmatprep.subr.bf16.mxu0 %v3406_v18  ;;  %3223 = vmatpush3.bf16.msra.mxu1 %v3602_v33 }
 0x443   :  { %3224 = vmatprep.subr.bf16.mxu1 %v3406_v18  ;;  %3005 = vmatprep.mubr.msk.f32.mxu1 %vm3407_vm2, %v3405_v5 }
 0x445   :  { %3220 = vmatpush3.bf16.msra.mxu0 %v3693_v61 }
 0x446   :  { %3227 = vmatprep.subr.bf16.mxu0 %v3406_v18  ;;  %3226 = vmatpush3.bf16.msra.mxu1 %v3618_v41 }
 0x447   :  { %3233 = vmatprep.subr.bf16.mxu1 %v3406_v18 }
 0x448   :  { %2995 = vmatmul.mubr.msk.f32.vlgmr.msra.gmra.mrb[28].mxu0 %vm43_vm0, %v1457_v19 }
 0x449   :  { %3229 = vmatpush3.bf16.msra.mxu0 %v3667_v54  ;;  %3016 = vmatprep.mubr.msk.f32.mxu0 %vm3407_vm2, %v3405_v5 }
 0x44a   :  { %3230 = vmatprep.subr.bf16.mxu0 %v3406_v18 }
 0x44d   :  { %3232 = vmatpush3.bf16.msra.mxu0 %v3687_v60 }
 0x44e   :  { %3239 = vmatprep.subr.bf16.mxu0 %v3406_v18 }
 0x513   :  { %v1527_v44 = vpop.f32.mrb[26].mxu0  ;;  %v1597_v21 = vpop.f32.mrb[22].mxu1 }
 0x514   :  { %v1671_v24 = vadd.f32 %v1527_v44, %v3746_v23  ;;  %v1678_v25 = vadd.f32 %v1597_v21, %v3744_v22  ;;  %v2974_v27 = vpop.f32.mrb[27].mxu0  ;;  %v2985_v29 = vpop.f32.mrb[23].mxu1 }
 0x516   :  { %v2592_v34 = vmul.f32 -1.442695, %v1671_v24  ;;  %v2593_v35 = vmul.f32 -1.442695, %v1678_v25 }
 0x518   :  { %3326 = vpow2.f32 %v2592_v34 }
 0x519   :  { %3328 = vpow2.f32 %v2593_v35 }
 0x51b   :  { %v1667_v32 = vpop.f32.mrb[28].mxu0 }
 0x51c   :  { %v2996_v36 = vpop.f32.mrb[29].mxu0  ;;  %v1668_v40 = vadd.f32 %v3776_v7, %v1667_v32 }
 0x522   :  { %v3327_v37 = vpop.eup %3326 }
 0x523   :  { %v1675_v14 = vadd.f32 1.0, %v3327_v37  ;;  %v3329_v13 = vpop.eup %3328 }
 0x524   :  { %v1682_v38 = vadd.f32 1.0, %v3329_v13 }
 0x525   :  { %3330 = vrcp.f32 %v1675_v14 }
 0x526   :  { %3332 = vrcp.f32 %v1682_v38 }
 0x52f   :  { %v3331_v42 = vpop.eup %3330 }
 0x530   :  { %v1685_v23 = vmul.f32 %v3331_v42, %v1668_v40  ;;  %v3333_v43 = vpop.eup %3332 }
 0x531   :  { %v1688_v45 = vsub.f32 1.0, %v3333_v43  ;;  %v1690_v48 = vmul.f32 %v3333_v43, %v1457_v19 }
 0x532   :  { %v1686_v22 = vadd.f32 %v1685_v23, %v3767_v55 }
 0x534   :  { %3334 = vtanh.f32 %v1686_v22  ;;  %v2396_v22 = vld [vmem:[%s3978_s6 + $0x10] sm:$0xff] }
 0x53e   :  { %v3335_v47 = vpop.eup %3334 }
 0x53f   :  { %v1689_v46 = vmul.f32 %v3335_v47, %v1688_v45 }
 0x541   :  { %v1691_v49 = vadd.f32 %v1690_v48, %v1689_v46 }
 0x543   :  { %3006 = vmatmul.mubr.msk.f32.vlgmr.msra.gmra.mrb[24].mxu1 %vm43_vm0, %v1691_v49  ;;  %3017 = vmatmul.mubr.msk.f32.vlgmr.msra.gmra.mrb[30].mxu0 %vm43_vm0, %v1691_v49 }
 0x544   :  { %3235 = vmatpush3.bf16.msra.mxu1 %v3676_v57  ;;  %3027 = vmatprep.mubr.msk.f32.mxu1 %vm3407_vm2, %v3405_v5 }
 0x545   :  { %3236 = vmatprep.subr.bf16.mxu1 %v3406_v18  ;;  %3241 = vmatpush3.bf16.msra.mxu0 %v3602_v33 }
 0x546   :  { %3242 = vmatprep.subr.bf16.mxu0 %v3406_v18  ;;  %3038 = vmatprep.mubr.msk.f32.mxu0 %vm3407_vm2, %v3405_v5 }
 0x548   :  { %3238 = vmatpush3.bf16.msra.mxu1 %v3693_v61 }
 0x549   :  { %3245 = vmatprep.subr.bf16.mxu1 %v3406_v18  ;;  %3244 = vmatpush3.bf16.msra.mxu0 %v3618_v41 }
 0x54a   :  { %3251 = vmatprep.subr.bf16.mxu0 %v3406_v18 }
 0x54b   :  { %3028 = vmatmul.mubr.msk.f32.vlgmr.msra.gmra.mrb[26].mxu1 %vm43_vm0, %v1691_v49 }
 0x54c   :  { %3247 = vmatpush3.bf16.msra.mxu1 %v3667_v54  ;;  %3049 = vmatprep.mubr.msk.f32.mxu1 %vm3407_vm2, %v3405_v5 }
 0x54d   :  { %3248 = vmatprep.subr.bf16.mxu1 %v3406_v18 }
 0x550   :  { %3250 = vmatpush3.bf16.msra.mxu1 %v3687_v60 }
 0x551   :  { %3257 = vmatprep.subr.bf16.mxu1 %v3406_v18 }
 0x616   :  { %v1761_v55 = vpop.f32.mrb[24].mxu1  ;;  %v1831_v50 = vpop.f32.mrb[30].mxu0 }
 0x617   :  { %v1905_v51 = vadd.f32 %v1761_v55, %v3742_v20  ;;  %v1912_v53 = vadd.f32 %v1831_v50, %v3740_v17  ;;  %v3007_v56 = vpop.f32.mrb[25].mxu1  ;;  %v3018_v58 = vpop.f32.mrb[31].mxu0 }
 0x619   :  { %v2597_v4 = vmul.f32 -1.442695, %v1905_v51  ;;  %v2598_v2 = vmul.f32 -1.442695, %v1912_v53 }
 0x61b   :  { %3336 = vpow2.f32 %v2597_v4 }
 0x61c   :  { %3338 = vpow2.f32 %v2598_v2 }
 0x61e   :  { %v1901_v63 = vpop.f32.mrb[26].mxu1 }
 0x61f   :  { %v3029_v1 = vpop.f32.mrb[27].mxu1  ;;  %v1902_v11 = vadd.f32 %v3776_v7, %v1901_v63 }
 0x625   :  { %v3337_v6 = vpop.eup %3336 }
 0x626   :  { %v1909_v62 = vadd.f32 1.0, %v3337_v6  ;;  %v3339_v3 = vpop.eup %3338 }
 0x627   :  { %v1916_v8 = vadd.f32 1.0, %v3339_v3 }
 0x628   :  { %3340 = vrcp.f32 %v1909_v62 }
 0x629   :  { %3342 = vrcp.f32 %v1916_v8 }
 0x632   :  { %v3341_v9 = vpop.eup %3340 }
 0x633   :  { %v1919_v20 = vmul.f32 %v3341_v9, %v1902_v11  ;;  %v3343_v39 = vpop.eup %3342 }
 0x634   :  { %v1922_v10 = vsub.f32 1.0, %v3343_v39  ;;  %v1924_v16 = vmul.f32 %v3343_v39, %v1691_v49 }
 0x635   :  { %v1920_v17 = vadd.f32 %v1919_v20, %v3765_v52  ;;  %v2609_v20 = vld [vmem:[%s3979_s7] ss:$0 sm:$0xff] }
 0x637   :  { %3344 = vtanh.f32 %v1920_v17 }
 0x641   :  { %v3345_v12 = vpop.eup %3344 }
 0x642   :  { %v1923_v15 = vmul.f32 %v3345_v12, %v1922_v10 }
 0x644   :  { %v1925_v19 = vadd.f32 %v1924_v16, %v1923_v15 }
 0x646   :  { %3039 = vmatmul.mubr.msk.f32.vlgmr.msra.gmra.mrb[32].mxu0 %vm43_vm0, %v1925_v19  ;;  %3050 = vmatmul.mubr.msk.f32.vlgmr.msra.gmra.mrb[28].mxu1 %vm43_vm0, %v1925_v19 }
 0x647   :  { %3253 = vmatpush3.bf16.msra.mxu0 %v3676_v57  ;;  %3060 = vmatprep.mubr.msk.f32.mxu0 %vm3407_vm2, %v3405_v5 }
 0x648   :  { %3254 = vmatprep.subr.bf16.mxu0 %v3406_v18  ;;  %3259 = vmatpush3.bf16.msra.mxu1 %v3602_v33 }
 0x649   :  { %3260 = vmatprep.subr.bf16.mxu1 %v3406_v18  ;;  %3071 = vmatprep.mubr.msk.f32.mxu1 %vm3407_vm2, %v3405_v5 }
 0x64b   :  { %3256 = vmatpush3.bf16.msra.mxu0 %v3693_v61 }
 0x64c   :  { %3263 = vmatprep.subr.bf16.mxu0 %v3406_v18  ;;  %3262 = vmatpush3.bf16.msra.mxu1 %v3618_v41 }
 0x64d   :  { %3269 = vmatprep.subr.bf16.mxu1 %v3406_v18 }
 0x64e   :  { %3061 = vmatmul.mubr.msk.f32.vlgmr.msra.gmra.mrb[34].mxu0 %vm43_vm0, %v1925_v19 }
 0x64f   :  { %3265 = vmatpush3.bf16.msra.mxu0 %v3667_v54  ;;  %3082 = vmatprep.mubr.msk.f32.mxu0 %vm3407_vm2, %v3405_v5 }
 0x650   :  { %3266 = vmatprep.subr.bf16.mxu0 %v3406_v18 }
 0x653   :  { %3268 = vmatpush3.bf16.msra.mxu0 %v3687_v60 }
 0x654   :  { %3275 = vmatprep.subr.bf16.mxu0 %v3406_v18 }
 0x719   :  { %v1995_v33 = vpop.f32.mrb[32].mxu0  ;;  %v2065_v52 = vpop.f32.mrb[28].mxu1 }
 0x71a   :  { %v2139_v44 = vadd.f32 %v1995_v33, %v3754_v31  ;;  %v2146_v41 = vadd.f32 %v2065_v52, %v3752_v30  ;;  %v3040_v21 = vpop.f32.mrb[33].mxu0  ;;  %v3051_v24 = vpop.f32.mrb[29].mxu1 }
 0x71c   :  { %v2602_v25 = vmul.f32 -1.442695, %v2139_v44  ;;  %v2603_v54 = vmul.f32 -1.442695, %v2146_v41 }
 0x71e   :  { %3346 = vpow2.f32 %v2602_v25 }
 0x71f   :  { %3348 = vpow2.f32 %v2603_v54 }
 0x721   :  { %v2135_v27 = vpop.f32.mrb[34].mxu0 }
 0x722   :  { %v3062_v29 = vpop.f32.mrb[35].mxu0  ;;  %v2136_v36 = vadd.f32 %v3776_v7, %v2135_v27 }
 0x728   :  { %v3347_v34 = vpop.eup %3346 }
 0x729   :  { %v2143_v35 = vadd.f32 1.0, %v3347_v34  ;;  %v3349_v60 = vpop.eup %3348 }
 0x72a   :  { %v2150_v32 = vadd.f32 1.0, %v3349_v60 }
 0x72b   :  { %3350 = vrcp.f32 %v2143_v35 }
 0x72c   :  { %3352 = vrcp.f32 %v2150_v32 }
 0x735   :  { %v3351_v37 = vpop.eup %3350 }
 0x736   :  { %v2153_v31 = vmul.f32 %v3351_v37, %v2136_v36  ;;  %v3353_v14 = vpop.eup %3352 }
 0x737   :  { %v2156_v13 = vsub.f32 1.0, %v3353_v14  ;;  %v2158_v42 = vmul.f32 %v3353_v14, %v1925_v19 }
 0x738   :  { %v2154_v30 = vadd.f32 %v2153_v31, %v3771_v0  ;;  %v2394_v0 = vld [vmem:[%s3978_s6] sm:$0xff] }
 0x73a   :  { %3354 = vtanh.f32 %v2154_v30 }
 0x744   :  { %v3355_v38 = vpop.eup %3354 }
 0x745   :  { %v2157_v40 = vmul.f32 %v3355_v38, %v2156_v13 }
 0x747   :  { %v2159_v23 = vadd.f32 %v2158_v42, %v2157_v40 }
 0x749   :  { %3072 = vmatmul.mubr.msk.f32.vlgmr.msra.gmra.mrb[30].mxu1 %vm43_vm0, %v2159_v23  ;;  %3083 = vmatmul.mubr.msk.f32.vlgmr.msra.gmra.mrb[36].mxu0 %vm43_vm0, %v2159_v23 }
 0x74a   :  { %3271 = vmatpush3.bf16.msra.mxu1 %v3676_v57  ;;  %3093 = vmatprep.mubr.msk.f32.mxu1 %vm3407_vm2, %v3405_v5  ;;  %v2395_v57 = vld [vmem:[%s3978_s6 + $0x8] sm:$0xff] }
 0x74b   :  { %3272 = vmatprep.subr.bf16.mxu1 %v3406_v18  ;;  %3104 = vmatprep.mubr.msk.f32.mxu0 %vm3407_vm2, %v3405_v5  ;;  %v3276_v43 = vpack.c.bf16 %v2395_v57, %v2394_v0  ;;  %v2397_v5 = vld [vmem:[%s3978_s6 + $0x18] sm:$0xff] }
 0x74d   :  { %3277 = vmatpush3.bf16.msra.mxu0 %v3276_v43 }
 0x74e   :  { %3274 = vmatpush3.bf16.msra.mxu1 %v3693_v61  ;;  %v3279_v61 = vpack.c.bf16 %v2397_v5, %v2396_v22  ;;  %3278 = vmatprep.subr.bf16.mxu0 %v3406_v18 }
 0x751   :  { %3094 = vmatmul.mubr.msk.f32.vlgmr.msra.gmra.mrb[32].mxu1 %vm43_vm0, %v2159_v23  ;;  %3280 = vmatpush3.bf16.msra.mxu0 %v3279_v61 }
 0x81c   :  { %v2229_v45 = vpop.f32.mrb[30].mxu1  ;;  %v2299_v47 = vpop.f32.mrb[36].mxu0 }
 0x81d   :  { %v2373_v46 = vadd.f32 %v2229_v45, %v3750_v28  ;;  %v2380_v48 = vadd.f32 %v2299_v47, %v3748_v26  ;;  %v3073_v49 = vpop.f32.mrb[31].mxu1  ;;  %v3084_v55 = vpop.f32.mrb[37].mxu0 }
 0x81f   :  { %v2607_v50 = vmul.f32 -1.442695, %v2373_v46  ;;  %v2608_v51 = vmul.f32 -1.442695, %v2380_v48 }
 0x821   :  { %3356 = vpow2.f32 %v2607_v50 }
 0x822   :  { %3358 = vpow2.f32 %v2608_v51 }
 0x824   :  { %v2369_v53 = vpop.f32.mrb[32].mxu1 }
 0x825   :  { %v3095_v56 = vpop.f32.mrb[33].mxu1  ;;  %v2370_v63 = vadd.f32 %v3776_v7, %v2369_v53 }
 0x82b   :  { %v3357_v58 = vpop.eup %3356 }
 0x82c   :  { %v2377_v4 = vadd.f32 1.0, %v3357_v58  ;;  %v3359_v2 = vpop.eup %3358 }
 0x82d   :  { %v2384_v18 = vadd.f32 1.0, %v3359_v2 }
 0x82e   :  { %3360 = vrcp.f32 %v2377_v4 }
 0x82f   :  { %3362 = vrcp.f32 %v2384_v18 }
 0x838   :  { %v3361_v1 = vpop.eup %3360 }
 0x839   :  { %v2387_v28 = vmul.f32 %v3361_v1, %v2370_v63  ;;  %v3363_v6 = vpop.eup %3362 }
 0x83a   :  { %v2390_v62 = vsub.f32 1.0, %v3363_v6  ;;  %v2392_v11 = vmul.f32 %v3363_v6, %v2159_v23 }
 0x83b   :  { %v2388_v26 = vadd.f32 %v2387_v28, %v3769_v59 }
 0x83d   :  { %3364 = vtanh.f32 %v2388_v26 }
 0x847   :  { %v3365_v3 = vpop.eup %3364 }
 0x848   :  { %v2391_v8 = vmul.f32 %v3365_v3, %v2390_v62 }
 0x84a   :  { %v2393_v9 = vadd.f32 %v2392_v11, %v2391_v8 }
 0x84c   :  { %3105 = vmatmul.mubr.msk.f32.vlgmr.msra.gmra.mrb[38].mxu0 %vm43_vm0, %v2393_v9 }
 0x91f   :  { %v2474_v7 = vpop.f32.mrb[38].mxu0 }
 0x920   :  { %v2475_v17 = vadd.f32 %v2609_v20, %v2474_v7  ;;  %v3106_v39 = vpop.f32.mrb[39].mxu0 }
 0x922   :  { %2479 = vst.msk [vmem:[#allocation6] sm:$0x3] %vm2478_vm3, %v2475_v17 }
 0x923   :  { %3389 = shalt.err (!%p3386_p9)
}
 0x924   :  { %s3390_s26 = scalar_lea.hbm %s3980_s8, 32 }
 0x925   :  { %p3391_p10 = scmp.ne.s32.totalorder %s3980_s8, %s3390_s26  ;;  %p3394_p11 = scmp.lt.u32.totalorder %s3390_s26, %s3980_s8 }
 0x927   :  { %p3396_p12 = pnand %p3394_p11, %p3391_p10 }
 0x929   :  { %3399 = shalt.err (!%p3396_p12)
}
 0x92a   :  { %2489 = dma.vmem_to_hbm [thread:$0]  %s2487_s0, 32, %s3980_s8, [#allocation4]  }
 0x92b   :  { %3402 = dma.done.wait [#allocation4], 32  }
 0x92c   :  { %3403 = vsyncadd [#allocation4], 4294967264 }
 0x92d   :  { %2493 = vsyncpa [#allocation4], 1 }
 0x92e   :  { %2494 = vsyncpa [#allocation5], 1 }

</bundles_post_ra>
